<compile_context>
chip_gen: v6e
topology: v6e:2x2x1
jax: 0.10.0
libtpu: 0.0.40
codegen_flags: <defaults>
</compile_context>

<pallas_src>
import functools

import jax
import jax.numpy as jnp
from jax.experimental import pallas as pl
from jax.experimental.pallas import tpu as pltpu


def _split_heads(x2d, num_heads, head_dim):
    """(N, C) -> (H, N, Dh).  H is small & static, so this is an unrolled
    sequence of lane slices stacked on a new leading (batch) axis."""
    return jnp.stack(
        [x2d[:, h * head_dim:(h + 1) * head_dim] for h in range(num_heads)],
        axis=0)


def _merge_heads(x3d, num_heads):
    """(H, N, Dh) -> (N, C)."""
    return jnp.concatenate([x3d[h] for h in range(num_heads)], axis=-1)


# --------------------------------------------------------------------------
# Fast path: the whole KV sequence fits in one tile (window attention case).
# Grid = (B,).  Plain softmax, no scratch.
# --------------------------------------------------------------------------
def _attention_single_kernel(x_ref,
                             wq_ref, bq_ref, wk_ref, bk_ref, wv_ref, bv_ref,
                             wp_ref, bp_ref,
                             o_ref,
                             *, num_heads, head_dim):
    H, Dh = num_heads, head_dim
    x = x_ref[0]                                                    # (N, C)
    dt = x.dtype

    q = (jnp.dot(x, wq_ref[...], preferred_element_type=jnp.float32)
         + bq_ref[0]).astype(dt)                                    # scale pre-folded
    k = (jnp.dot(x, wk_ref[...], preferred_element_type=jnp.float32)
         + bk_ref[0]).astype(dt)
    v = (jnp.dot(x, wv_ref[...], preferred_element_type=jnp.float32)
         + bv_ref[0]).astype(dt)

    q3 = _split_heads(q, H, Dh)                                     # (H, N, Dh)
    k3 = _split_heads(k, H, Dh)
    v3 = _split_heads(v, H, Dh)

    s = jnp.einsum('hnd,hmd->hnm', q3, k3,
                   preferred_element_type=jnp.float32)              # (H, N, N)
    m = jnp.max(s, axis=-1, keepdims=True)
    p = jnp.exp(s - m)
    l = jnp.sum(p, axis=-1, keepdims=True)
    out3 = jnp.einsum('hnm,hmd->hnd', p.astype(dt), v3,
                      preferred_element_type=jnp.float32)           # (H, N, Dh)
    out3 = out3 * pl.reciprocal(l, approx=True)                     # EUP vrcp

    out2 = _merge_heads(out3, H).astype(dt)                         # (N, C)
    y = jnp.dot(out2, wp_ref[...],
                preferred_element_type=jnp.float32) + bp_ref[0]
    o_ref[0] = y.astype(o_ref.dtype)


# --------------------------------------------------------------------------
# Streaming path: grid = (batch, kv_tiles).  One batch element's queries stay
# resident; K/V tiles stream through with an online-softmax update.
# --------------------------------------------------------------------------
def _attention_flash_kernel(xq_ref, xkv_ref,
                            wq_ref, bq_ref, wk_ref, bk_ref, wv_ref, bv_ref,
                            wp_ref, bp_ref,
                            o_ref,
                            q_s, m_s, l_s, acc_s,
                            *, num_heads, head_dim):
    H, Dh = num_heads, head_dim
    j = pl.program_id(1)
    n_kv = pl.num_programs(1)

    # ---- first KV step for this batch element: project q, init running stats
    @pl.when(j == 0)
    def _init():
        x = xq_ref[0]                                               # (N, C)
        q = jnp.dot(x, wq_ref[...],
                    preferred_element_type=jnp.float32) + bq_ref[0]  # scale pre-folded
        q_s[...] = _split_heads(q.astype(q_s.dtype), H, Dh)         # (H, N, Dh)
        m_s[...] = jnp.full_like(m_s, -jnp.inf)
        l_s[...] = jnp.zeros_like(l_s)
        acc_s[...] = jnp.zeros_like(acc_s)

    # ---- project this KV tile (separate Wk / Wv -> no fused-kv lane slicing)
    xk = xkv_ref[0]                                                 # (TK, C)
    k = (jnp.dot(xk, wk_ref[...], preferred_element_type=jnp.float32)
         + bk_ref[0]).astype(xk.dtype)
    v = (jnp.dot(xk, wv_ref[...], preferred_element_type=jnp.float32)
         + bv_ref[0]).astype(xk.dtype)
    k3 = _split_heads(k, H, Dh)                                     # (H, TK, Dh)
    v3 = _split_heads(v, H, Dh)                                     # (H, TK, Dh)

    # ---- head-batched scores + online softmax update (flash pattern)
    s = jnp.einsum('hnd,hmd->hnm', q_s[...], k3,
                   preferred_element_type=jnp.float32)              # (H, N, TK)
    m_new = jnp.maximum(m_s[...], jnp.max(s, axis=-1, keepdims=True))
    alpha = jnp.exp(m_s[...] - m_new)
    p = jnp.exp(s - m_new)
    l_s[...] = alpha * l_s[...] + jnp.sum(p, axis=-1, keepdims=True)
    acc_s[...] = alpha * acc_s[...] + jnp.einsum(
        'hnm,hmd->hnd', p.astype(v3.dtype), v3,
        preferred_element_type=jnp.float32)
    m_s[...] = m_new

    # ---- last KV step: normalize, merge heads, output projection, store
    @pl.when(j == n_kv - 1)
    def _finalize():
        inv_l = pl.reciprocal(l_s[...], approx=True)                # EUP vrcp
        out3 = acc_s[...] * inv_l                                   # (H, N, Dh)
        out2 = _merge_heads(out3, H).astype(xq_ref.dtype)           # (N, C)
        y = jnp.dot(out2, wp_ref[...],
                    preferred_element_type=jnp.float32) + bp_ref[0]
        o_ref[0] = y.astype(o_ref.dtype)


def attention_pallas(x, wq, bq, wkv, bkv, wp, bp, *, num_heads, scale,
                     kv_tile=None):
    B, N, C = x.shape
    assert C % num_heads == 0, "dim must be divisible by num_heads"
    Dh = C // num_heads

    if kv_tile is None:
        kv_tile = N if N <= 128 else 128
    assert N % kv_tile == 0, "N must be divisible by kv_tile"
    n_kv = N // kv_tile

    # Fold the softmax scale into the q projection (constant fold on weights).
    wq_s = (wq * scale).astype(wq.dtype)
    bq_s = (bq * scale).astype(bq.dtype)
    # Split fused kv projection so the kernel gets whole, tile-aligned k / v.
    wk, wv = wkv[:, :C], wkv[:, C:]
    bk, bv = bkv[:, :C], bkv[:, C:]

    # Explicit VMEM budget (double-buffered blocks + weights + scratch +
    # score temporaries), with generous headroom; clamped to stay inside
    # v7x's smaller physical VMEM.
    isz = x.dtype.itemsize
    est = (2 * N * C * isz                 # resident query block of x (x2 buf)
           + 2 * kv_tile * C * isz         # streamed kv tile of x (x2 buf)
           + 2 * 4 * C * C * isz           # Wq, Wk, Wv, Wproj
           + 2 * 6 * C * isz               # biases
           + 2 * N * C * isz               # output block
           + num_heads * N * Dh * isz      # q slab
           + num_heads * N * (Dh + 2) * 4  # acc / m / l (f32)
           + 2 * num_heads * N * kv_tile * 4)  # score / prob temporaries (f32)
    vmem_limit = int(min(max(4 * est, 8 << 20), 32 << 20))

    weight_args = (wq_s, bq_s, wk, bk, wv, bv, wp, bp)

    if n_kv == 1:
        # ---------------- single-tile fast path ----------------
        kernel = functools.partial(_attention_single_kernel,
                                   num_heads=num_heads, head_dim=Dh)
        w_specs = [pl.BlockSpec((C, C), lambda b: (0, 0)),   # Wq (scaled)
                   pl.BlockSpec((1, C), lambda b: (0, 0)),   # bq (scaled)
                   pl.BlockSpec((C, C), lambda b: (0, 0)),   # Wk
                   pl.BlockSpec((1, C), lambda b: (0, 0)),   # bk
                   pl.BlockSpec((C, C), lambda b: (0, 0)),   # Wv
                   pl.BlockSpec((1, C), lambda b: (0, 0)),   # bv
                   pl.BlockSpec((C, C), lambda b: (0, 0)),   # Wproj
                   pl.BlockSpec((1, C), lambda b: (0, 0))]   # bproj
        return pl.pallas_call(
            kernel,
            out_shape=jax.ShapeDtypeStruct((B, N, C), x.dtype),
            grid_spec=pltpu.PrefetchScalarGridSpec(
                num_scalar_prefetch=0,
                grid=(B,),
                in_specs=[pl.BlockSpec((1, N, C), lambda b: (b, 0, 0))] + w_specs,
                out_specs=pl.BlockSpec((1, N, C), lambda b: (b, 0, 0)),
            ),
            compiler_params=pltpu.CompilerParams(
                dimension_semantics=("parallel",),
                vmem_limit_bytes=vmem_limit,
            ),
        )(x, *weight_args)

    # ---------------- streaming (online-softmax) path ----------------
    kernel = functools.partial(_attention_flash_kernel,
                               num_heads=num_heads, head_dim=Dh)
    w_specs = [pl.BlockSpec((C, C), lambda b, j: (0, 0)),    # Wq (scaled)
               pl.BlockSpec((1, C), lambda b, j: (0, 0)),    # bq (scaled)
               pl.BlockSpec((C, C), lambda b, j: (0, 0)),    # Wk
               pl.BlockSpec((1, C), lambda b, j: (0, 0)),    # bk
               pl.BlockSpec((C, C), lambda b, j: (0, 0)),    # Wv
               pl.BlockSpec((1, C), lambda b, j: (0, 0)),    # bv
               pl.BlockSpec((C, C), lambda b, j: (0, 0)),    # Wproj
               pl.BlockSpec((1, C), lambda b, j: (0, 0))]    # bproj
    return pl.pallas_call(
        kernel,
        out_shape=jax.ShapeDtypeStruct((B, N, C), x.dtype),
        grid_spec=pltpu.PrefetchScalarGridSpec(
            num_scalar_prefetch=0,
            grid=(B, n_kv),
            in_specs=[
                pl.BlockSpec((1, N, C), lambda b, j: (b, 0, 0)),        # x (queries)
                pl.BlockSpec((1, kv_tile, C), lambda b, j: (b, j, 0)),  # x (kv tile)
            ] + w_specs,
            out_specs=pl.BlockSpec((1, N, C), lambda b, j: (b, 0, 0)),
            scratch_shapes=[
                pltpu.VMEM((num_heads, N, Dh), x.dtype),      # q (heads split)
                pltpu.VMEM((num_heads, N, 1), jnp.float32),   # running max m
                pltpu.VMEM((num_heads, N, 1), jnp.float32),   # running denom l
                pltpu.VMEM((num_heads, N, Dh), jnp.float32),  # output accumulator
            ],
        ),
        compiler_params=pltpu.CompilerParams(
            dimension_semantics=("parallel", "arbitrary"),
            vmem_limit_bytes=vmem_limit,
        ),
    )(x, x, *weight_args)


def attention_reference(x, wq, bq, wkv, bkv, wp, bp, *, num_heads, scale):
    """Pure-JAX reference mirroring the PyTorch forward exactly."""
    B, N, C = x.shape
    Dh = C // num_heads
    q = (x @ wq + bq).reshape(B, N, num_heads, Dh).transpose(0, 2, 1, 3)
    kv = x @ wkv + bkv
    k = kv[..., :C].reshape(B, N, num_heads, Dh).transpose(0, 2, 1, 3)
    v = kv[..., C:].reshape(B, N, num_heads, Dh).transpose(0, 2, 1, 3)
    attn = jax.nn.softmax((q * scale) @ jnp.swapaxes(k, -2, -1), axis=-1)
    out = (attn @ v).transpose(0, 2, 1, 3).reshape(B, N, C)
    return out @ wp + bp


if __name__ == "__main__":
    # Small config consistent with the module: dim=32, num_heads=4, seq=16, batch=2
    B, N, C = 2, 16, 32
    num_heads = 4
    head_dim = C // num_heads
    scale = head_dim ** (-0.5)

    key = jax.random.PRNGKey(0)
    kx, kq, kbq, kkv, kbkv, kp, kbp = jax.random.split(key, 7)

    x = jax.random.normal(kx, (B, N, C), dtype=jnp.float32)
    wq = 0.05 * jax.random.normal(kq, (C, C), dtype=jnp.float32)
    bq = 0.01 * jax.random.normal(kbq, (1, C), dtype=jnp.float32)
    wkv = 0.05 * jax.random.normal(kkv, (C, 2 * C), dtype=jnp.float32)
    bkv = 0.01 * jax.random.normal(kbkv, (1, 2 * C), dtype=jnp.float32)
    wp = 0.05 * jax.random.normal(kp, (C, C), dtype=jnp.float32)
    bp = 0.01 * jax.random.normal(kbp, (1, C), dtype=jnp.float32)

    ref = attention_reference(x, wq, bq, wkv, bkv, wp, bp,
                              num_heads=num_heads, scale=scale)

    # 1) Streaming path: kv_tile=8 -> 2 KV steps, so the online-softmax
    #    accumulation is actually exercised (not just the degenerate case).
    out_multi = attention_pallas(x, wq, bq, wkv, bkv, wp, bp,
                                 num_heads=num_heads, scale=scale, kv_tile=8)
    out_multi = jax.block_until_ready(out_multi)
    assert out_multi.shape == (B, N, C)
    # Tolerance accommodates the EUP approximate reciprocal in the softmax
    # denominator (pl.reciprocal(approx=True)); exact recip matches to ~1e-4.
    assert jnp.allclose(out_multi, ref, rtol=5e-3, atol=5e-3), \
        "streaming path mismatch vs reference"

    # 2) Single-tile fast path (whole KV sequence in one tile, N <= 128).
    out_single = attention_pallas(x, wq, bq, wkv, bkv, wp, bp,
                                  num_heads=num_heads, scale=scale)
    out_single = jax.block_until_ready(out_single)
    assert out_single.shape == (B, N, C)
    assert jnp.allclose(out_single, ref, rtol=5e-3, atol=5e-3), \
        "single-tile path mismatch vs reference"

    print("KERNEL_OK")
</pallas_src>

<mosaic_0001>
module attributes {stable_mosaic.version = 11 : i64} {
  func.func @_attention_flash_kernel(%arg0: i32, %arg1: i32, %arg2: memref<1x16x32xf32, #tpu.memory_space<vmem>>, %arg3: memref<1x8x32xf32, #tpu.memory_space<vmem>>, %arg4: memref<32x32xf32, #tpu.memory_space<vmem>>, %arg5: memref<1x32xf32, #tpu.memory_space<vmem>>, %arg6: memref<32x32xf32, #tpu.memory_space<vmem>>, %arg7: memref<1x32xf32, #tpu.memory_space<vmem>>, %arg8: memref<32x32xf32, #tpu.memory_space<vmem>>, %arg9: memref<1x32xf32, #tpu.memory_space<vmem>>, %arg10: memref<32x32xf32, #tpu.memory_space<vmem>>, %arg11: memref<1x32xf32, #tpu.memory_space<vmem>>, %arg12: memref<1x16x32xf32, #tpu.memory_space<vmem>>, %arg13: memref<4x16x8xf32, #tpu.memory_space<vmem>>, %arg14: memref<4x16x1xf32, #tpu.memory_space<vmem>>, %arg15: memref<4x16x1xf32, #tpu.memory_space<vmem>>, %arg16: memref<4x16x8xf32, #tpu.memory_space<vmem>>) attributes {dimension_semantics = [#tpu.dimension_semantics<parallel>, #tpu.dimension_semantics<arbitrary>], iteration_bounds = array<i64: 2, 2>, scalar_prefetch = 0 : i64, scratch_operands = 4 : i64, tpu.core_type = #tpu.core_type<tc>, window_params = [{transform_indices = @transform_0, window_bounds = array<i64: 1, 16, 32>}, {transform_indices = @transform_1, window_bounds = array<i64: 1, 8, 32>}, {pipeline_mode = #tpu.pipeline_mode<synchronous>, transform_indices = @transform_2, window_bounds = array<i64: 32, 32>}, {pipeline_mode = #tpu.pipeline_mode<synchronous>, transform_indices = @transform_3, window_bounds = array<i64: 1, 32>}, {pipeline_mode = #tpu.pipeline_mode<synchronous>, transform_indices = @transform_4, window_bounds = array<i64: 32, 32>}, {pipeline_mode = #tpu.pipeline_mode<synchronous>, transform_indices = @transform_5, window_bounds = array<i64: 1, 32>}, {pipeline_mode = #tpu.pipeline_mode<synchronous>, transform_indices = @transform_6, window_bounds = array<i64: 32, 32>}, {pipeline_mode = #tpu.pipeline_mode<synchronous>, transform_indices = @transform_7, window_bounds = array<i64: 1, 32>}, {pipeline_mode = #tpu.pipeline_mode<synchronous>, transform_indices = @transform_8, window_bounds = array<i64: 32, 32>}, {pipeline_mode = #tpu.pipeline_mode<synchronous>, transform_indices = @transform_9, window_bounds = array<i64: 1, 32>}, {transform_indices = @transform_10, window_bounds = array<i64: 1, 16, 32>}]} {
    %c0_i32 = arith.constant 0 : i32
    %0 = arith.cmpi eq, %arg1, %c0_i32 : i32
    %1 = arith.extui %0 : i1 to i32
    %c0_i32_0 = arith.constant 0 : i32
    %2 = arith.cmpi ne, %1, %c0_i32_0 : i32
    scf.if %2 {
      %c0_41 = arith.constant 0 : index
      %c0_42 = arith.constant 0 : index
      %c0_43 = arith.constant 0 : index
      %65 = vector.load %arg2[%c0_41, %c0_42, %c0_43] : memref<1x16x32xf32, #tpu.memory_space<vmem>>, vector<1x16x32xf32>
      %66 = vector.shape_cast %65 : vector<1x16x32xf32> to vector<16x32xf32>
      %c0_44 = arith.constant 0 : index
      %c0_45 = arith.constant 0 : index
      %67 = vector.load %arg4[%c0_44, %c0_45] : memref<32x32xf32, #tpu.memory_space<vmem>>, vector<32x32xf32>
      %cst_46 = arith.constant dense<0.000000e+00> : vector<16x32xf32>
      %68 = tpu.matmul %66, %67, %cst_46 {dimension_numbers = #tpu.dot_dimension_numbers<[1], [0], [0], [1], [0, 0, 1, 1], [], []>} : vector<16x32xf32>, vector<32x32xf32>, vector<16x32xf32> -> vector<16x32xf32>
      %c0_47 = arith.constant 0 : index
      %c0_48 = arith.constant 0 : index
      %69 = vector.load %arg5[%c0_47, %c0_48] : memref<1x32xf32, #tpu.memory_space<vmem>>, vector<1x32xf32>
      %70 = vector.shape_cast %69 : vector<1x32xf32> to vector<32xf32>
      %71 = vector.shape_cast %70 : vector<32xf32> to vector<1x32xf32>
      %72 = vector.broadcast %71 : vector<1x32xf32> to vector<16x32xf32>
      %73 = arith.addf %68, %72 : vector<16x32xf32>
      %74 = vector.extract_strided_slice %73 {offsets = [0, 0], sizes = [16, 8], strides = [1, 1]} : vector<16x32xf32> to vector<16x8xf32>
      %75 = vector.extract_strided_slice %73 {offsets = [0, 8], sizes = [16, 8], strides = [1, 1]} : vector<16x32xf32> to vector<16x8xf32>
      %76 = vector.extract_strided_slice %73 {offsets = [0, 16], sizes = [16, 8], strides = [1, 1]} : vector<16x32xf32> to vector<16x8xf32>
      %77 = vector.extract_strided_slice %73 {offsets = [0, 24], sizes = [16, 8], strides = [1, 1]} : vector<16x32xf32> to vector<16x8xf32>
      %78 = vector.shape_cast %74 : vector<16x8xf32> to vector<1x16x8xf32>
      %79 = vector.shape_cast %75 : vector<16x8xf32> to vector<1x16x8xf32>
      %80 = vector.shape_cast %76 : vector<16x8xf32> to vector<1x16x8xf32>
      %81 = vector.shape_cast %77 : vector<16x8xf32> to vector<1x16x8xf32>
      %82 = tpu.concatenate %78, %79, %80, %81 in 0 : vector<1x16x8xf32>, vector<1x16x8xf32>, vector<1x16x8xf32>, vector<1x16x8xf32> -> vector<4x16x8xf32>
      %c0_49 = arith.constant 0 : index
      %c0_50 = arith.constant 0 : index
      %c0_51 = arith.constant 0 : index
      %83 = vector.load %arg13[%c0_49, %c0_50, %c0_51] : memref<4x16x8xf32, #tpu.memory_space<vmem>>, vector<4x16x8xf32>
      tpu.vector_store %arg13[%c0_49, %c0_50, %c0_51], %82 {strides = array<i32>} : memref<4x16x8xf32, #tpu.memory_space<vmem>>, vector<4x16x8xf32>,
      %cst_52 = arith.constant 0xFF800000 : f32
      %84 = vector.broadcast %cst_52 : f32 to vector<4x16x1xf32>
      %c0_53 = arith.constant 0 : index
      %c0_54 = arith.constant 0 : index
      %c0_55 = arith.constant 0 : index
      %85 = vector.load %arg14[%c0_53, %c0_54, %c0_55] : memref<4x16x1xf32, #tpu.memory_space<vmem>>, vector<4x16x1xf32>
      tpu.vector_store %arg14[%c0_53, %c0_54, %c0_55], %84 {strides = array<i32>} : memref<4x16x1xf32, #tpu.memory_space<vmem>>, vector<4x16x1xf32>,
      %cst_56 = arith.constant 0.000000e+00 : f32
      %86 = vector.broadcast %cst_56 : f32 to vector<4x16x1xf32>
      %c0_57 = arith.constant 0 : index
      %c0_58 = arith.constant 0 : index
      %c0_59 = arith.constant 0 : index
      %87 = vector.load %arg15[%c0_57, %c0_58, %c0_59] : memref<4x16x1xf32, #tpu.memory_space<vmem>>, vector<4x16x1xf32>
      tpu.vector_store %arg15[%c0_57, %c0_58, %c0_59], %86 {strides = array<i32>} : memref<4x16x1xf32, #tpu.memory_space<vmem>>, vector<4x16x1xf32>,
      %cst_60 = arith.constant 0.000000e+00 : f32
      %88 = vector.broadcast %cst_60 : f32 to vector<4x16x8xf32>
      %c0_61 = arith.constant 0 : index
      %c0_62 = arith.constant 0 : index
      %c0_63 = arith.constant 0 : index
      %89 = vector.load %arg16[%c0_61, %c0_62, %c0_63] : memref<4x16x8xf32, #tpu.memory_space<vmem>>, vector<4x16x8xf32>
      tpu.vector_store %arg16[%c0_61, %c0_62, %c0_63], %88 {strides = array<i32>} : memref<4x16x8xf32, #tpu.memory_space<vmem>>, vector<4x16x8xf32>,
    } else {
    }
    %c0 = arith.constant 0 : index
    %c0_1 = arith.constant 0 : index
    %c0_2 = arith.constant 0 : index
    %3 = vector.load %arg3[%c0, %c0_1, %c0_2] : memref<1x8x32xf32, #tpu.memory_space<vmem>>, vector<1x8x32xf32>
    %4 = vector.shape_cast %3 : vector<1x8x32xf32> to vector<8x32xf32>
    %c0_3 = arith.constant 0 : index
    %c0_4 = arith.constant 0 : index
    %5 = vector.load %arg6[%c0_3, %c0_4] : memref<32x32xf32, #tpu.memory_space<vmem>>, vector<32x32xf32>
    %cst = arith.constant dense<0.000000e+00> : vector<8x32xf32>
    %6 = tpu.matmul %4, %5, %cst {dimension_numbers = #tpu.dot_dimension_numbers<[1], [0], [0], [1], [0, 0, 1, 1], [], []>} : vector<8x32xf32>, vector<32x32xf32>, vector<8x32xf32> -> vector<8x32xf32>
    %c0_5 = arith.constant 0 : index
    %c0_6 = arith.constant 0 : index
    %7 = vector.load %arg7[%c0_5, %c0_6] : memref<1x32xf32, #tpu.memory_space<vmem>>, vector<1x32xf32>
    %8 = vector.shape_cast %7 : vector<1x32xf32> to vector<32xf32>
    %9 = vector.shape_cast %8 : vector<32xf32> to vector<1x32xf32>
    %10 = vector.broadcast %9 : vector<1x32xf32> to vector<8x32xf32>
    %11 = arith.addf %6, %10 : vector<8x32xf32>
    %c0_7 = arith.constant 0 : index
    %c0_8 = arith.constant 0 : index
    %12 = vector.load %arg8[%c0_7, %c0_8] : memref<32x32xf32, #tpu.memory_space<vmem>>, vector<32x32xf32>
    %cst_9 = arith.constant dense<0.000000e+00> : vector<8x32xf32>
    %13 = tpu.matmul %4, %12, %cst_9 {dimension_numbers = #tpu.dot_dimension_numbers<[1], [0], [0], [1], [0, 0, 1, 1], [], []>} : vector<8x32xf32>, vector<32x32xf32>, vector<8x32xf32> -> vector<8x32xf32>
    %c0_10 = arith.constant 0 : index
    %c0_11 = arith.constant 0 : index
    %14 = vector.load %arg9[%c0_10, %c0_11] : memref<1x32xf32, #tpu.memory_space<vmem>>, vector<1x32xf32>
    %15 = vector.shape_cast %14 : vector<1x32xf32> to vector<32xf32>
    %16 = vector.shape_cast %15 : vector<32xf32> to vector<1x32xf32>
    %17 = vector.broadcast %16 : vector<1x32xf32> to vector<8x32xf32>
    %18 = arith.addf %13, %17 : vector<8x32xf32>
    %19 = vector.extract_strided_slice %11 {offsets = [0, 0], sizes = [8, 8], strides = [1, 1]} : vector<8x32xf32> to vector<8x8xf32>
    %20 = vector.extract_strided_slice %11 {offsets = [0, 8], sizes = [8, 8], strides = [1, 1]} : vector<8x32xf32> to vector<8x8xf32>
    %21 = vector.extract_strided_slice %11 {offsets = [0, 16], sizes = [8, 8], strides = [1, 1]} : vector<8x32xf32> to vector<8x8xf32>
    %22 = vector.extract_strided_slice %11 {offsets = [0, 24], sizes = [8, 8], strides = [1, 1]} : vector<8x32xf32> to vector<8x8xf32>
    %23 = vector.shape_cast %19 : vector<8x8xf32> to vector<1x8x8xf32>
    %24 = vector.shape_cast %20 : vector<8x8xf32> to vector<1x8x8xf32>
    %25 = vector.shape_cast %21 : vector<8x8xf32> to vector<1x8x8xf32>
    %26 = vector.shape_cast %22 : vector<8x8xf32> to vector<1x8x8xf32>
    %27 = tpu.concatenate %23, %24, %25, %26 in 0 : vector<1x8x8xf32>, vector<1x8x8xf32>, vector<1x8x8xf32>, vector<1x8x8xf32> -> vector<4x8x8xf32>
    %28 = vector.extract_strided_slice %18 {offsets = [0, 0], sizes = [8, 8], strides = [1, 1]} : vector<8x32xf32> to vector<8x8xf32>
    %29 = vector.extract_strided_slice %18 {offsets = [0, 8], sizes = [8, 8], strides = [1, 1]} : vector<8x32xf32> to vector<8x8xf32>
    %30 = vector.extract_strided_slice %18 {offsets = [0, 16], sizes = [8, 8], strides = [1, 1]} : vector<8x32xf32> to vector<8x8xf32>
    %31 = vector.extract_strided_slice %18 {offsets = [0, 24], sizes = [8, 8], strides = [1, 1]} : vector<8x32xf32> to vector<8x8xf32>
    %32 = vector.shape_cast %28 : vector<8x8xf32> to vector<1x8x8xf32>
    %33 = vector.shape_cast %29 : vector<8x8xf32> to vector<1x8x8xf32>
    %34 = vector.shape_cast %30 : vector<8x8xf32> to vector<1x8x8xf32>
    %35 = vector.shape_cast %31 : vector<8x8xf32> to vector<1x8x8xf32>
    %36 = tpu.concatenate %32, %33, %34, %35 in 0 : vector<1x8x8xf32>, vector<1x8x8xf32>, vector<1x8x8xf32>, vector<1x8x8xf32> -> vector<4x8x8xf32>
    %c0_12 = arith.constant 0 : index
    %c0_13 = arith.constant 0 : index
    %c0_14 = arith.constant 0 : index
    %37 = vector.load %arg13[%c0_12, %c0_13, %c0_14] : memref<4x16x8xf32, #tpu.memory_space<vmem>>, vector<4x16x8xf32>
    "tpu.trace_start"() <{level = 10 : i32, message = "hnd,hmd->hnm"}> : () -> ()
    %cst_15 = arith.constant dense<0.000000e+00> : vector<4x16x8xf32>
    %38 = tpu.matmul %37, %27, %cst_15 {dimension_numbers = #tpu.dot_dimension_numbers<[2], [2], [1], [1], [0, 0, 0, 1, 1, 1], [0], [0]>} : vector<4x16x8xf32>, vector<4x8x8xf32>, vector<4x16x8xf32> -> vector<4x16x8xf32>
    "tpu.trace_stop"() : () -> ()
    %c0_16 = arith.constant 0 : index
    %c0_17 = arith.constant 0 : index
    %c0_18 = arith.constant 0 : index
    %39 = vector.load %arg14[%c0_16, %c0_17, %c0_18] : memref<4x16x1xf32, #tpu.memory_space<vmem>>, vector<4x16x1xf32>
    %cst_19 = arith.constant dense<0xFF800000> : vector<4x16xf32>
    %40 = vector.multi_reduction <maximumf>, %38, %cst_19 [2] : vector<4x16x8xf32> to vector<4x16xf32>
    %41 = vector.shape_cast %40 : vector<4x16xf32> to vector<4x16x1xf32>
    %42 = arith.maximumf %39, %41 : vector<4x16x1xf32>
    %c0_20 = arith.constant 0 : index
    %c0_21 = arith.constant 0 : index
    %c0_22 = arith.constant 0 : index
    %43 = vector.load %arg14[%c0_20, %c0_21, %c0_22] : memref<4x16x1xf32, #tpu.memory_space<vmem>>, vector<4x16x1xf32>
    %44 = arith.subf %43, %42 : vector<4x16x1xf32>
    %45 = math.exp %44 : vector<4x16x1xf32>
    %46 = vector.broadcast %42 : vector<4x16x1xf32> to vector<4x16x8xf32>
    %47 = arith.subf %38, %46 : vector<4x16x8xf32>
    %48 = math.exp %47 : vector<4x16x8xf32>
    %c0_23 = arith.constant 0 : index
    %c0_24 = arith.constant 0 : index
    %c0_25 = arith.constant 0 : index
    %49 = vector.load %arg15[%c0_23, %c0_24, %c0_25] : memref<4x16x1xf32, #tpu.memory_space<vmem>>, vector<4x16x1xf32>
    %50 = arith.mulf %45, %49 : vector<4x16x1xf32>
    %cst_26 = arith.constant dense<0.000000e+00> : vector<4x16xf32>
    %51 = vector.multi_reduction <add>, %48, %cst_26 [2] : vector<4x16x8xf32> to vector<4x16xf32>
    %52 = vector.shape_cast %51 : vector<4x16xf32> to vector<4x16x1xf32>
    %53 = arith.addf %50, %52 : vector<4x16x1xf32>
    %c0_27 = arith.constant 0 : index
    %c0_28 = arith.constant 0 : index
    %c0_29 = arith.constant 0 : index
    %54 = vector.load %arg15[%c0_27, %c0_28, %c0_29] : memref<4x16x1xf32, #tpu.memory_space<vmem>>, vector<4x16x1xf32>
    tpu.vector_store %arg15[%c0_27, %c0_28, %c0_29], %53 {strides = array<i32>} : memref<4x16x1xf32, #tpu.memory_space<vmem>>, vector<4x16x1xf32>,
    %c0_30 = arith.constant 0 : index
    %c0_31 = arith.constant 0 : index
    %c0_32 = arith.constant 0 : index
    %55 = vector.load %arg16[%c0_30, %c0_31, %c0_32] : memref<4x16x8xf32, #tpu.memory_space<vmem>>, vector<4x16x8xf32>
    %56 = vector.broadcast %45 : vector<4x16x1xf32> to vector<4x16x8xf32>
    %57 = arith.mulf %56, %55 : vector<4x16x8xf32>
    "tpu.trace_start"() <{level = 10 : i32, message = "hnm,hmd->hnd"}> : () -> ()
    %cst_33 = arith.constant dense<0.000000e+00> : vector<4x16x8xf32>
    %58 = tpu.matmul %48, %36, %cst_33 {dimension_numbers = #tpu.dot_dimension_numbers<[2], [1], [1], [2], [0, 0, 0, 1, 1, 2], [0], [0]>} : vector<4x16x8xf32>, vector<4x8x8xf32>, vector<4x16x8xf32> -> vector<4x16x8xf32>
    "tpu.trace_stop"() : () -> ()
    %59 = arith.addf %57, %58 : vector<4x16x8xf32>
    %c0_34 = arith.constant 0 : index
    %c0_35 = arith.constant 0 : index
    %c0_36 = arith.constant 0 : index
    %60 = vector.load %arg16[%c0_34, %c0_35, %c0_36] : memref<4x16x8xf32, #tpu.memory_space<vmem>>, vector<4x16x8xf32>
    tpu.vector_store %arg16[%c0_34, %c0_35, %c0_36], %59 {strides = array<i32>} : memref<4x16x8xf32, #tpu.memory_space<vmem>>, vector<4x16x8xf32>,
    %c0_37 = arith.constant 0 : index
    %c0_38 = arith.constant 0 : index
    %c0_39 = arith.constant 0 : index
    %61 = vector.load %arg14[%c0_37, %c0_38, %c0_39] : memref<4x16x1xf32, #tpu.memory_space<vmem>>, vector<4x16x1xf32>
    tpu.vector_store %arg14[%c0_37, %c0_38, %c0_39], %42 {strides = array<i32>} : memref<4x16x1xf32, #tpu.memory_space<vmem>>, vector<4x16x1xf32>,
    %c1_i32 = arith.constant 1 : i32
    %62 = arith.cmpi eq, %arg1, %c1_i32 : i32
    %63 = arith.extui %62 : i1 to i32
    %c0_i32_40 = arith.constant 0 : i32
    %64 = arith.cmpi ne, %63, %c0_i32_40 : i32
    scf.if %64 {
      %c0_41 = arith.constant 0 : index
      %c0_42 = arith.constant 0 : index
      %c0_43 = arith.constant 0 : index
      %65 = vector.load %arg15[%c0_41, %c0_42, %c0_43] : memref<4x16x1xf32, #tpu.memory_space<vmem>>, vector<4x16x1xf32>
      %66 = tpu.reciprocal %65 {approx = true} : vector<4x16x1xf32> -> vector<4x16x1xf32>
      %c0_44 = arith.constant 0 : index
      %c0_45 = arith.constant 0 : index
      %c0_46 = arith.constant 0 : index
      %67 = vector.load %arg16[%c0_44, %c0_45, %c0_46] : memref<4x16x8xf32, #tpu.memory_space<vmem>>, vector<4x16x8xf32>
      %68 = vector.broadcast %66 : vector<4x16x1xf32> to vector<4x16x8xf32>
      %69 = arith.mulf %67, %68 : vector<4x16x8xf32>
      %70 = vector.extract_strided_slice %69 {offsets = [0, 0, 0], sizes = [1, 16, 8], strides = [1, 1, 1]} : vector<4x16x8xf32> to vector<1x16x8xf32>
      %71 = vector.shape_cast %70 : vector<1x16x8xf32> to vector<16x8xf32>
      %72 = vector.extract_strided_slice %69 {offsets = [1, 0, 0], sizes = [1, 16, 8], strides = [1, 1, 1]} : vector<4x16x8xf32> to vector<1x16x8xf32>
      %73 = vector.shape_cast %72 : vector<1x16x8xf32> to vector<16x8xf32>
      %74 = vector.extract_strided_slice %69 {offsets = [2, 0, 0], sizes = [1, 16, 8], strides = [1, 1, 1]} : vector<4x16x8xf32> to vector<1x16x8xf32>
      %75 = vector.shape_cast %74 : vector<1x16x8xf32> to vector<16x8xf32>
      %76 = vector.extract_strided_slice %69 {offsets = [3, 0, 0], sizes = [1, 16, 8], strides = [1, 1, 1]} : vector<4x16x8xf32> to vector<1x16x8xf32>
      %77 = vector.shape_cast %76 : vector<1x16x8xf32> to vector<16x8xf32>
      %78 = tpu.concatenate %71, %73, %75, %77 in 1 : vector<16x8xf32>, vector<16x8xf32>, vector<16x8xf32>, vector<16x8xf32> -> vector<16x32xf32>
      %c0_47 = arith.constant 0 : index
      %c0_48 = arith.constant 0 : index
      %79 = vector.load %arg10[%c0_47, %c0_48] : memref<32x32xf32, #tpu.memory_space<vmem>>, vector<32x32xf32>
      %cst_49 = arith.constant dense<0.000000e+00> : vector<16x32xf32>
      %80 = tpu.matmul %78, %79, %cst_49 {dimension_numbers = #tpu.dot_dimension_numbers<[1], [0], [0], [1], [0, 0, 1, 1], [], []>} : vector<16x32xf32>, vector<32x32xf32>, vector<16x32xf32> -> vector<16x32xf32>
      %c0_50 = arith.constant 0 : index
      %c0_51 = arith.constant 0 : index
      %81 = vector.load %arg11[%c0_50, %c0_51] : memref<1x32xf32, #tpu.memory_space<vmem>>, vector<1x32xf32>
      %82 = vector.shape_cast %81 : vector<1x32xf32> to vector<32xf32>
      %83 = vector.shape_cast %82 : vector<32xf32> to vector<1x32xf32>
      %84 = vector.broadcast %83 : vector<1x32xf32> to vector<16x32xf32>
      %85 = arith.addf %80, %84 : vector<16x32xf32>
      %c0_52 = arith.constant 0 : index
      %c0_53 = arith.constant 0 : index
      %c0_54 = arith.constant 0 : index
      %86 = vector.load %arg12[%c0_52, %c0_53, %c0_54] : memref<1x16x32xf32, #tpu.memory_space<vmem>>, vector<1x16x32xf32>
      %87 = vector.shape_cast %86 : vector<1x16x32xf32> to vector<16x32xf32>
      %88 = vector.shape_cast %85 : vector<16x32xf32> to vector<1x16x32xf32>
      tpu.vector_store %arg12[%c0_52, %c0_53, %c0_54], %88 {strides = array<i32>} : memref<1x16x32xf32, #tpu.memory_space<vmem>>, vector<1x16x32xf32>,
    } else {
    }
    return
  }
  func.func @transform_0(%arg0: i32, %arg1: i32) -> (i32, i32, i32) {
    %c0_i32 = arith.constant 0 : i32
    %c0_i32_0 = arith.constant 0 : i32
    %c0_i32_1 = arith.constant 0 : i32
    return %arg0, %c0_i32, %c0_i32_0 : i32, i32, i32
  }
  func.func @transform_1(%arg0: i32, %arg1: i32) -> (i32, i32, i32) {
    %c0_i32 = arith.constant 0 : i32
    %c0_i32_0 = arith.constant 0 : i32
    return %arg0, %arg1, %c0_i32 : i32, i32, i32
  }
  func.func @transform_2(%arg0: i32, %arg1: i32) -> (i32, i32) {
    %c0_i32 = arith.constant 0 : i32
    %c0_i32_0 = arith.constant 0 : i32
    %c0_i32_1 = arith.constant 0 : i32
    return %c0_i32, %c0_i32_0 : i32, i32
  }
  func.func @transform_3(%arg0: i32, %arg1: i32) -> (i32, i32) {
    %c0_i32 = arith.constant 0 : i32
    %c0_i32_0 = arith.constant 0 : i32
    %c0_i32_1 = arith.constant 0 : i32
    return %c0_i32, %c0_i32_0 : i32, i32
  }
  func.func @transform_4(%arg0: i32, %arg1: i32) -> (i32, i32) {
    %c0_i32 = arith.constant 0 : i32
    %c0_i32_0 = arith.constant 0 : i32
    %c0_i32_1 = arith.constant 0 : i32
    return %c0_i32, %c0_i32_0 : i32, i32
  }
  func.func @transform_5(%arg0: i32, %arg1: i32) -> (i32, i32) {
    %c0_i32 = arith.constant 0 : i32
    %c0_i32_0 = arith.constant 0 : i32
    %c0_i32_1 = arith.constant 0 : i32
    return %c0_i32, %c0_i32_0 : i32, i32
  }
  func.func @transform_6(%arg0: i32, %arg1: i32) -> (i32, i32) {
    %c0_i32 = arith.constant 0 : i32
    %c0_i32_0 = arith.constant 0 : i32
    %c0_i32_1 = arith.constant 0 : i32
    return %c0_i32, %c0_i32_0 : i32, i32
  }
  func.func @transform_7(%arg0: i32, %arg1: i32) -> (i32, i32) {
    %c0_i32 = arith.constant 0 : i32
    %c0_i32_0 = arith.constant 0 : i32
    %c0_i32_1 = arith.constant 0 : i32
    return %c0_i32, %c0_i32_0 : i32, i32
  }
  func.func @transform_8(%arg0: i32, %arg1: i32) -> (i32, i32) {
    %c0_i32 = arith.constant 0 : i32
    %c0_i32_0 = arith.constant 0 : i32
    %c0_i32_1 = arith.constant 0 : i32
    return %c0_i32, %c0_i32_0 : i32, i32
  }
  func.func @transform_9(%arg0: i32, %arg1: i32) -> (i32, i32) {
    %c0_i32 = arith.constant 0 : i32
    %c0_i32_0 = arith.constant 0 : i32
    %c0_i32_1 = arith.constant 0 : i32
    return %c0_i32, %c0_i32_0 : i32, i32
  }
  func.func @transform_10(%arg0: i32, %arg1: i32) -> (i32, i32, i32) {
    %c0_i32 = arith.constant 0 : i32
    %c0_i32_0 = arith.constant 0 : i32
    %c0_i32_1 = arith.constant 0 : i32
    return %arg0, %c0_i32, %c0_i32_0 : i32, i32, i32
  }
}

</mosaic_0001>

<bundles_post_ra>
// kernel: tpu_custom_call.1
= control target key start
LH: loop header
LB: loop body
LE: loop exit
PB: predicated region body
PF: predicated region fallthrough
CT: control target
= control target key end

     0   :  { %s3466_s0 = inlined_call_operand.hbm [shape: f32[2,16,32], index: 0, kind: input, shape index: {}]   ;;  %s3467_s1 = inlined_call_operand.hbm [shape: f32[2,16,32], index: 1, kind: input, shape index: {}]   ;;  %s3468_s2 = inlined_call_operand.hbm [shape: f32[32,32], index: 2, kind: input, shape index: {}]   ;;  %s3469_s3 = inlined_call_operand.vmem [shape: f32[1,32], index: 3, kind: input, shape index: {}]   ;;  %s3470_s4 = inlined_call_operand.hbm [shape: f32[32,32], index: 4, kind: input, shape index: {}]   ;;  %s3471_s5 = inlined_call_operand.vmem [shape: f32[1,32], index: 5, kind: input, shape index: {}]   ;;  %s3472_s6 = inlined_call_operand.hbm [shape: f32[32,32], index: 6, kind: input, shape index: {}]   ;;  %s3473_s7 = inlined_call_operand.vmem [shape: f32[1,32], index: 7, kind: input, shape index: {}]   ;;  %s3474_s8 = inlined_call_operand.hbm [shape: f32[32,32], index: 8, kind: input, shape index: {}]   ;;  %s3475_s9 = inlined_call_operand.vmem [shape: f32[1,32], index: 9, kind: input, shape index: {}]   ;;  %s3476_s10 = inlined_call_operand.hbm [shape: f32[2,16,32], index: 10, kind: output, shape index: {}]  }
   0x1   :  { %3490 = sst [smem:[#allocation31_spill]] %s3466_s0 }
   0x2   :  { %3491 = sst [smem:[#allocation32_spill]] %s3468_s2 }
   0x3   :  { %3492 = sst [smem:[#allocation33_spill]] %s3469_s3 }
   0x4   :  { %3493 = sst [smem:[#allocation34_spill]] %s3470_s4 }
   0x5   :  { %3494 = sst [smem:[#allocation35_spill]] %s3471_s5 }
   0x6   :  { %3495 = sst [smem:[#allocation36_spill]] %s3472_s6 }
   0x7   :  { %3496 = sst [smem:[#allocation37_spill]] %s3473_s7 }
   0x8   :  { %3497 = sst [smem:[#allocation38_spill]] %s3474_s8 }
   0x9   :  { %3498 = sst [smem:[#allocation39_spill]] %s3475_s9 }
   0xa   :  { %3499 = sst [smem:[#allocation40_spill]] %s3476_s10 }
   0xb   :  { %15 = vsyncpa [#allocation7], 0 }
   0xc   :  { %17 = vsyncpa [#allocation7 + $0x1], 0 }
   0xd   :  { %18 = vsyncpa [#allocation10], 0 }
   0xe   :  { %20 = vsyncpa [#allocation10 + $0x1], 0 }
   0xf   :  { %21 = vsyncpa [#allocation13], 0 }
  0x10   :  { %22 = vsyncpa [#allocation16], 0 }
  0x11   :  { %23 = vsyncpa [#allocation8], 0 }
  0x12   :  { %25 = vsyncpa [#allocation8 + $0x1], 0  ;;  %s2908_s13 = smov 0   ;;  %s2910_s14 = smov 0  }
  0x13   :  { %s2912_s15 = smov 0   ;;  %s2914_s16 = smov 0  }
  0x14   :  { %s2916_s17 = smov 0   ;;  %s2918_s18 = smov 0  }
  0x15   :  { %s2920_s19 = smov 0   ;;  %s2922_s20 = smov 0  }
  0x16   :  { %s2924_s21 = smov 0   ;;  %s2926_s22 = smov 0  }
  0x17   :  { %s2928_s23 = smov 0  }
  0x18 LB: > { %3500 = sst [smem:[#allocation24_spill]] %s2797_s16  ;;  %s2964_s24 = sadd.s32 4294967295, %s2825_s23   ;;  %s2825_s23 = sphi %s2928_s23, %s31_s23   ;;  %s2821_s22 = sphi %s2926_s22, %s3557_s22   ;;  %s2817_s21 = sphi %s2924_s21, %s3556_s21   ;;  %s2813_s20 = sphi %s2922_s20, %s3555_s20   ;;  %s2809_s19 = sphi %s2920_s19, %s3554_s19   ;;  %s2805_s18 = sphi %s2918_s18, %s3553_s18   ;;  %s2801_s17 = sphi %s2916_s17, %s3552_s17   ;;  %s2797_s16 = sphi %s2914_s16, %s3551_s16   ;;  %s2793_s15 = sphi %s2912_s15, %s3550_s15   ;;  %s2789_s14 = sphi %s2910_s14, %s3549_s14   ;;  %s2785_s13 = sphi %s2908_s13, %s3548_s13  }
  0x19   : > { %3501 = sst [smem:[#allocation25_spill]] %s2809_s19  ;;  %p2121_p0 = scmp.ge.s32.totalorder %s2825_s23, 1 }
  0x1a   : > { %3502 = sst [smem:[#allocation26_spill]] %s2813_s20  ;;  %p3482_p1 = scmp.eq.s32.totalorder %s2964_s24, 0 }
  0x1b   : > { %p283_p2 = scmp.eq.s32.totalorder %s2964_s24, 3  ;;  %p296_p3 = scmp.lt.s32.totalorder %s2825_s23, 5 }
  0x1c   : > { %s2827_s26 = smov [#allocation11]   ;;  %s2828_s29 = smov [#allocation12]  }
  0x1d   : > { %p2970_p4 = pnand %p2121_p0, %p296_p3  ;;  %s308_s27 = sshll.u32 %s2827_s26, 4  ;;  %s309_s27 = int_to_ptr.vmem [resolvable:$true] %s308_s27 }
  0x1e   : > { %s324_s30 = sshll.u32 %s2828_s29, 4  ;;  %s2829_s11 = smov [#allocation14]   ;;  %s2982_s30 = int_to_ptr.vmem [resolvable:$true] %s324_s30 }
  0x1f   : > { %p2332_p5 = pneg %p2970_p4  ;;  %s340_s12 = sshll.u32 %s2829_s11, 4  ;;  %s2984_s12 = int_to_ptr.vmem [resolvable:$true] %s340_s12 }
  0x20   : > { %s2540_s26 = scalar_lea.vmem %s309_s27, 512  ;;  %p2548_p11 = scmp.lt.s32.totalorder %s309_s27, %s309_s27 }
  0x21   : > { %p2978_p6 = pnand %p2332_p5, %p3482_p1  ;;  %p2541_p8 = scmp.ne.s32.totalorder %s309_s27, %s2540_s26 }
  0x22   : > { %p2549_p12 = scmp.lt.s32.totalorder %s2540_s26, %s2540_s26 }
  0x23   : > { %p2531_p7 = pneg %p2978_p6 }
  0x24   : > { %p2550_p13 = por %p2549_p12, %p2548_p11 }
  0x25   : > { %p2543_p9 = pnand %p2541_p8, %p2531_p7 }
  0x27   : > { %p2544_p10 = pneg %p2543_p9 }
  0x29   : > { %p2551_p0 = pnand %p2550_p13, %p2544_p10 }
  0x2b   : > { %2554 = shalt.err (!%p2551_p0)
}
  0x2c   : > { %s3478_s29 = smov 128   ;;  %s3479_s11 = smov 8  }
  0x2d   : > { %s3505_s2 = sld [smem:[#allocation32_spill]]  ;;  %s2566_s9 = scalar_lea.vmem %s2982_s30, 512 }
  0x2e   : > { %p2567_p3 = scmp.ne.s32.totalorder %s2982_s30, %s2566_s9  ;;  %p2574_p9 = scmp.lt.s32.totalorder %s2982_s30, %s2982_s30 }
  0x2f   : > { %p2575_p10 = scmp.lt.s32.totalorder %s2566_s9, %s2566_s9 }
  0x30   : > { %p2569_p5 = pnand %p2567_p3, %p2531_p7 }
  0x31   : > { %p2576_p11 = por %p2575_p10, %p2574_p9 }
  0x32   : > { %p2570_p8 = pneg %p2569_p5 }
  0x33   : > { %2335 = dma.hbm_to_vmem [thread:$0]  (!%p2978_p6), %s3505_s2, 512, %s309_s27, [#allocation10], %s3478_s29, %s3478_s29, %s3479_s11  }
  0x34   : > { %p2577_p12 = pnand %p2576_p11, %p2570_p8 }
  0x36   : > { %2580 = shalt.err (!%p2577_p12)
}
  0x37   : > { %s3506_s4 = sld [smem:[#allocation34_spill]]  ;;  %s2592_s27 = scalar_lea.vmem %s2984_s12, 512 }
  0x38   : > { %p2593_p13 = scmp.ne.s32.totalorder %s2984_s12, %s2592_s27  ;;  %p2600_p5 = scmp.lt.s32.totalorder %s2984_s12, %s2984_s12 }
  0x39   : > { %p2601_p8 = scmp.lt.s32.totalorder %s2592_s27, %s2592_s27 }
  0x3a   : > { %p2595_p0 = pnand %p2593_p13, %p2531_p7 }
  0x3b   : > { %p2602_p9 = por %p2601_p8, %p2600_p5 }
  0x3c   : > { %p2596_p3 = pneg %p2595_p0 }
  0x3d   : > { %2338 = dma.hbm_to_vmem [thread:$0]  (!%p2978_p6), %s3506_s4, 512, %s2982_s30, [#allocation13], %s3478_s29, %s3478_s29, %s3479_s11  }
  0x3e   : > { %p2603_p10 = pnand %p2602_p9, %p2596_p3 }
  0x40   : > { %2606 = shalt.err (!%p2603_p10)
}
  0x41   : > { %s3507_s6 = sld [smem:[#allocation36_spill]]  ;;  %s2832_s26 = smov [#allocation15]  }
  0x42   : > { %s356_s10 = sshll.u32 %s2832_s26, 4  ;;  %s357_s10 = int_to_ptr.vmem [resolvable:$true] %s356_s10 }
  0x43   : > { %s2618_s20 = scalar_lea.vmem %s357_s10, 512  ;;  %p2626_p0 = scmp.lt.s32.totalorder %s357_s10, %s357_s10 }
  0x44   : > { %p2619_p11 = scmp.ne.s32.totalorder %s357_s10, %s2618_s20  ;;  %p2627_p3 = scmp.lt.s32.totalorder %s2618_s20, %s2618_s20 }
  0x46   : > { %p2621_p12 = pnand %p2619_p11, %p2531_p7  ;;  %p2628_p5 = por %p2627_p3, %p2626_p0 }
  0x47   : > { %2341 = dma.hbm_to_vmem [thread:$0]  (!%p2978_p6), %s3507_s6, 512, %s2984_s12, [#allocation13], %s3478_s29, %s3478_s29, %s3479_s11  }
  0x48   : > { %p2622_p13 = pneg %p2621_p12 }
  0x4a   : > { %p2629_p8 = pnand %p2628_p5, %p2622_p13 }
  0x4c   : > { %2632 = shalt.err (!%p2629_p8)
}
  0x4d   : > { %s3508_s8 = sld [smem:[#allocation38_spill]]  ;;  %s2120_s28 = sadd.s32 4294967294, %s2825_s23  }
  0x4e   : > { %p57_p7 = scmp.ne.s32.totalorder %s2805_s18, %s2801_s17  ;;  %p3483_p9 = scmp.eq.s32.totalorder %s2825_s23, 0 }
  0x4f   : > { %p63_p10 = scmp.ne.s32.totalorder %s2801_s17, %s2797_s16  ;;  %p289_p12 = scmp.eq.s32.totalorder %s2120_s28, 3 }
  0x50   : > { %p3051_p11 = por %p283_p2, %p57_p7  ;;  %p59_p13 = por %p3483_p9, %p57_p7 }
  0x51   : > { %p3059_p0 = por %p3482_p1, %p63_p10  ;;  %p2360_p3 = scmp.lt.s32.totalorder %s2825_s23, 4 }
  0x52   : > { %s3509_s30 = scalar_select %p3051_p11, 1, 0 }
  0x53   : > { %2344 = dma.hbm_to_vmem [thread:$0]  (!%p2978_p6), %s3508_s8, 512, %s357_s10, [#allocation16], %s3478_s29, %s3478_s29, %s3479_s11  }
  0x54   : > { %3510 = sst [smem:[#allocation27_spill]] %s3509_s30  ;;  %p3063_p6 = por %p289_p12, %p63_p10 }
  0x55   : > { %s373_s20 = sand.u32 1, %s2805_s18   ;;  %s2178_s12 = sshll.u32 %s2821_s22, 8 }
  0x56   : > { %s3512_s10 = scalar_select %p3063_p6, 1, 0 }
  0x57   : > { %s2127_s27 = sshll.u32 %s373_s20, 4  ;;  %s3514_s0 = sld [smem:[#allocation31_spill]] }
  0x58   : > { %3513 = sst [smem:[#allocation28_spill]] %s3512_s10  ;;  %s377_s28 = scalar_lea.vmem [#allocation6], %s2127_s27 }
  0x59   : > { %s384_s2 = sshll.u32 %s377_s28, 4  ;;  %p3075_p2 = pnand %p2360_p3, %p59_p13  ;;  %s385_s2 = int_to_ptr.vmem [resolvable:$true] %s384_s2 }
  0x5a   : > { %s374_s6 = scalar_lea.sflag [#allocation7], %s373_s20  ;;  %s2646_s8 = scalar_lea.vmem %s385_s2, 256 }
  0x5b   : > { %p2635_p5 = pneg %p3075_p2  ;;  %p2647_p8 = scmp.ne.s32.totalorder %s385_s2, %s2646_s8 }
  0x5c   : > { %s2833_s10 = smov [#allocation6]  }
  0x5d   : > { %s383_s11 = scalar_lea.hbm %s3514_s0, %s2178_s12  ;;  %p2649_p7 = pnand %p2647_p8, %p2635_p5 }
  0x5e   : > { %s2651_s16 = sshll.u32 %s2833_s10, 4  ;;  %s2652_s16 = int_to_ptr.vmem [resolvable:$false] %s2651_s16 }
  0x5f   : > { %p2650_p10 = pneg %p2649_p7  ;;  %s2653_s29 = scalar_lea.vmem %s2652_s16, 512 }
  0x60   : > { %p2654_p12 = scmp.lt.s32.totalorder %s385_s2, %s2652_s16  ;;  %p2655_p1 = scmp.lt.s32.totalorder %s2653_s29, %s2646_s8 }
  0x62   : > { %p2656_p9 = por %p2655_p1, %p2654_p12 }
  0x64   : > { %p2657_p13 = pnand %p2656_p9, %p2650_p10 }
  0x66   : > { %2660 = shalt.err (!%p2657_p13)
}
  0x67   : > { %s3516_s9 = smov 8   ;;  %s3517_s12 = smov 128  }
  0x68   : > { %2348 = dma.hbm_to_vmem [thread:$0]  (!%p3075_p2), %s383_s11, 256, %s385_s2, %s374_s6, %s3517_s12, %s3517_s12, %s3516_s9  }
  0x69   : > { %s40_s8 = sadd.s32 1, %s2817_s21  ;;  %s43_s4 = sadd.s32 1, %s2821_s22 }
  0x6a   : > { %p41_p1 = scmp.ge.s32.totalorder %s40_s8, 2  ;;  %s78_s16 = sadd.s32 1, %s2793_s15 }
  0x6b   : > { %p85_p9 = scmp.ne.s32.totalorder %s2793_s15, %s2789_s14  ;;  %p91_p5 = scmp.ne.s32.totalorder %s2789_s14, %s2785_s13 }
  0x6c   : > { %s3559_s8 = smov (%p41_p1, %s40_s8), 0  ;;  %s3561_s4 = smov (!%p41_p1, %s43_s4), %s2821_s22 }
  0x6d   : > { %3518 = sst [smem:[#allocation29_spill]] %s3559_s8  ;;  %s74_s10 = ssub.s32 %s2817_s21, %s3559_s8 }
  0x6e   : > { %p3519_p8 = scmp.eq.s32.totalorder %s2825_s23, 0  ;;  %p45_p2 = scmp.ge.s32.totalorder %s3561_s4, 2 }
  0x6f   : > { %p3521_p10 = scmp.eq.s32.totalorder %s2964_s24, 0  ;;  %s394_s13 = sand.u32 1, %s2825_s23  }
  0x70   : > { %p3100_p7 = por %p85_p9, %p3519_p8  ;;  %s396_s11 = sand.u32 1, %s2793_s15  }
  0x71   : > { %p3106_p12 = por %p91_p5, %p3521_p10  ;;  %s3563_s4 = smov (%p45_p2, %s3561_s4), 0 }
  0x72   : > { %s2130_s20 = sshll.u32 %s396_s11, 3  ;;  %s47_s27 = ssub.s32 %s2821_s22, %s3563_s4 }
  0x73   : > { %s3522_s6 = scalar_select %p3106_p12, 1, 0 }
  0x74   : > { %p48_p13 = scmp.eq.s32.totalorder %s47_s27, 0  ;;  %s75_s28 = sor.u32 %s74_s10, %s47_s27 }
  0x75   : > { %3523 = sst [smem:[#allocation30_spill]] %s3522_s6  ;;  %p76_p1 = scmp.eq.s32.totalorder %s75_s28, 0 }
  0x76   : > { %s2131_s29 = sshll.u32 %s2821_s22, 1  ;;  %s3524_s9 = sadd.s32 1, %s2805_s18 }
  0x77   : > { %s3120_s12 = scalar_select %p48_p13, %s2805_s18, %s3524_s9  }
  0x78   : > { %s3123_s0 = scalar_select %p76_p1, %s2793_s15, %s78_s16  }
  0x79   : > { %s403_s8 = sadd.s32 %s2817_s21, %s2131_s29  ;;  %s398_s30 = scalar_lea.vmem [#allocation9], %s2130_s20 }
  0x7a   : > { %s407_s7 = sshll.u32 %s398_s30, 4  ;;  %s2132_s5 = sshll.u32 %s403_s8, 7  ;;  %s408_s7 = int_to_ptr.vmem [resolvable:$true] %s407_s7 }
  0x7b   : > { %s405_s6 = scalar_lea.hbm %s3467_s1, %s2132_s5  ;;  %p3133_p9 = pnand %p2360_p3, %p3100_p7 }
  0x7c   : > { %s395_s11 = scalar_lea.sflag [#allocation10], %s394_s13  ;;  %s2674_s16 = scalar_lea.vmem %s408_s7, 128 }
  0x7d   : > { %p2663_p5 = pneg %p3133_p9  ;;  %p2675_p8 = scmp.ne.s32.totalorder %s408_s7, %s2674_s16 }
  0x7e   : > { %s2834_s30 = smov [#allocation9]  }
  0x7f   : > { %p2677_p2 = pnand %p2675_p8, %p2663_p5  ;;  %s2679_s8 = sshll.u32 %s2834_s30, 4  ;;  %s2680_s8 = int_to_ptr.vmem [resolvable:$false] %s2679_s8 }
  0x80   : > { %s2681_s20 = scalar_lea.vmem %s2680_s8, 256  ;;  %p2682_p13 = scmp.lt.s32.totalorder %s408_s7, %s2680_s8 }
  0x81   : > { %p2678_p10 = pneg %p2677_p2  ;;  %p2683_p1 = scmp.lt.s32.totalorder %s2681_s20, %s2674_s16 }
  0x83   : > { %p2684_p6 = por %p2683_p1, %p2682_p13 }
  0x85   : > { %p2685_p11 = pnand %p2684_p6, %p2678_p10 }
  0x87   : > { %2688 = shalt.err (!%p2685_p11)
}
  0x88   : > { %2351 = dma.hbm_to_vmem [thread:$0]  (!%p3133_p9), %s405_s6, 128, %s408_s7, %s395_s11  }
  0x89   : > { %416 = sbr.rel (%p2970_p4) target bundleno = 2016 (0x7e0), region = 60  ;;  %s3144_s3 = sand.u32 (!%p2970_p4), 1, %s2801_s17  }
  0x8a   : > { %s2134_s5 = sshll.u32 (!%p2970_p4), %s3144_s3, 4  ;;  %s419_s19 = scalar_lea.sflag (!%p2970_p4), [#allocation7], %s3144_s3 }
  0x8b   : > { %s3148_s2 = scalar_lea.vmem (!%p2970_p4), [#allocation6], %s2134_s5 }
  0x8e   : > { %2760 = dma.done.wait (%p3059_p0), %s419_s19, 256  }
  0x8f   : > { %2762 = vsyncadd (%p3059_p0), %s419_s19, 4294967040  ;;  %s427_s25 = sand.u32 1, %s2964_s24   ;;  %s429_s6 = sand.u32 1, %s2789_s14  }
  0x90   : > { %s3156_s13 = sshll.u32 %s429_s6, 3  ;;  %s428_s27 = scalar_lea.sflag [#allocation10], %s427_s25 }
  0x91   : > { %s431_s28 = scalar_lea.vmem [#allocation9], %s3156_s13 }
  0x92   : > { %2764 = dma.done.wait (%p3106_p12), %s428_s27, 128  }
  0x93   : > { %2766 = vsyncadd (%p3106_p12), %s428_s27, 4294967168  ;;  %p3527_p4 = scmp.eq.s32.totalorder %s2964_s24, 0 }
  0x95   : > { %2768 = dma.done.wait (%p3527_p4), [#allocation10], 512   ;;  %p3528_p11 = pmov %p3527_p4 }
  0x96   : > { %p3529_p0 = pmov %p3527_p4 }
  0x97   : > { %2770 = vsyncadd (%p3528_p11), [#allocation10], 4294966784 }
  0x98   : > { %2772 = dma.done.wait (%p3529_p0), [#allocation13], 1024   ;;  %p3530_p6 = pmov %p3529_p0 }
  0x99   : > { %p3531_p3 = pmov %p3529_p0 }
  0x9a   : > { %2774 = vsyncadd (%p3530_p6), [#allocation13], 4294966272 }
  0x9b   : > { %2776 = dma.done.wait (%p3531_p3), [#allocation16], 512   ;;  %p3532_p7 = pmov %p3529_p0 }
  0x9c   : > { %s3175_s26 = scalar_lea.vmem [#allocation17], %s2134_s5  ;;  %s3533_s29 = sld [smem:[#allocation25_spill]] }
  0x9d   : > { %2778 = vsyncadd (%p3532_p7), [#allocation16], 4294966784 }
  0xa2   : > { %p2141_p12 = scmp.ne.s32.totalorder %s3533_s29, 0 }
  0xa3   : > { %s3534_s10 = sld [smem:[#allocation33_spill]] (!%p2141_p12)  ;;  %s2837_s11 = smov (!%p2141_p12), 112  }
  0xa4   : > { %492 = sbr.rel (%p2141_p12) target bundleno = 497 (0x1f1), region = 88  ;;  %s2838_s16 = smov (!%p2141_p12), 120  }
  0xa5   : > { %s2839_s30 = smov (!%p2141_p12), 104  }
  0xa9   : > { %v498_v0 = vld [vmem:[#allocation11 + $0x18] sm:$0xff]  ;;  %v497_v1 = vld [vmem:[#allocation11 + $0x10] sm:$0xff]  ;;  %vm506_vm0 = vcmask 261120   ;;  %v496_v3 = vld [vmem:[#allocation11 + $0x8] sm:$0xff]  ;;  %vm608_vm1 = vcmask 64512   ;;  %vm617_vm2 = vcmask 7168  }
  0xaa   : > { %2226 = vmatprep.subr.mxu0 %v498_v0  ;;  %v493_v2 = vld [vmem:[%s3148_s2] sm:$0xff]  ;;  %v494_v5 = vld [vmem:[%s3148_s2 + $0x8] sm:$0xff]  ;;  %v2835_v6 = vmov -inf   ;;  %v2836_v7 = vmov 0.0  }
  0xab   : > { %2227 = vmatpush3.msra.mxu0 %v498_v0  ;;  %2234 = vmatprep.mubr.msk.f32.mxu0 %vm506_vm0, %v493_v2  ;;  %v495_v4 = vld [vmem:[#allocation11] sm:$0xff]  ;;  %618 = vst.msk [vmem:[#allocation3] sm:$0xff] %vm617_vm2, %v2835_v6  ;;  %619 = vst.msk [vmem:[#allocation3 + $0x8] sm:$0xff] %vm617_vm2, %v2835_v6  ;;  %v2142_v8 = vld [vmem:[%s3534_s10] ss:$0 sm:$0xff] }
  0xac   : > { %2228 = vmatprep.subr.mxu0 %v497_v1  ;;  %620 = vst.msk [vmem:[#allocation3 + $0x10] sm:$0xff] %vm617_vm2, %v2835_v6  ;;  %621 = vst.msk [vmem:[#allocation3 + $0x18] sm:$0xff] %vm617_vm2, %v2835_v6 }
  0xad   : > { %2229 = vmatpush3.msra.mxu0 %v497_v1  ;;  %622 = vst.msk [vmem:[#allocation3 + $0x20] sm:$0xff] %vm617_vm2, %v2835_v6  ;;  %623 = vst.msk [vmem:[#allocation3 + $0x28] sm:$0xff] %vm617_vm2, %v2835_v6 }
  0xae   : > { %2230 = vmatprep.subr.mxu0 %v496_v3  ;;  %624 = vst.msk [vmem:[#allocation3 + $0x30] sm:$0xff] %vm617_vm2, %v2835_v6  ;;  %625 = vst.msk [vmem:[#allocation3 + $0x38] sm:$0xff] %vm617_vm2, %v2835_v6 }
  0xaf   : > { %2231 = vmatpush3.msra.mxu0 %v496_v3  ;;  %626 = vst.msk [vmem:[#allocation4] sm:$0xff] %vm617_vm2, %v2836_v7  ;;  %627 = vst.msk [vmem:[#allocation4 + $0x8] sm:$0xff] %vm617_vm2, %v2836_v7 }
  0xb0   : > { %2232 = vmatprep.subr.mxu0 %v495_v4  ;;  %628 = vst.msk [vmem:[#allocation4 + $0x10] sm:$0xff] %vm617_vm2, %v2836_v7  ;;  %629 = vst.msk [vmem:[#allocation4 + $0x18] sm:$0xff] %vm617_vm2, %v2836_v7 }
  0xb1   : > { %2233 = vmatpush3.msra.mxu0 %v495_v4  ;;  %630 = vst.msk [vmem:[#allocation4 + $0x20] sm:$0xff] %vm617_vm2, %v2836_v7  ;;  %631 = vst.msk [vmem:[#allocation4 + $0x28] sm:$0xff] %vm617_vm2, %v2836_v7 }
  0xb2   : > { %2235 = vmatmul.mubr.msk.f32.vlgmr.msra.gmra.mxu0 %vm506_vm0, %v494_v5  ;;  %632 = vst.msk [vmem:[#allocation4 + $0x30] sm:$0xff] %vm617_vm2, %v2836_v7  ;;  %633 = vst.msk [vmem:[#allocation4 + $0x38] sm:$0xff] %vm617_vm2, %v2836_v7 }
  0xb3   : > { %634 = vst.msk [vmem:[#allocation5] sm:$0xff] %vm608_vm1, %v2836_v7  ;;  %635 = vst.msk [vmem:[#allocation5 + $0x8] sm:$0xff] %vm608_vm1, %v2836_v7 }
  0xb4   : > { %636 = vst.msk [vmem:[#allocation5 + $0x10] sm:$0xff] %vm608_vm1, %v2836_v7  ;;  %637 = vst.msk [vmem:[#allocation5 + $0x18] sm:$0xff] %vm608_vm1, %v2836_v7 }
  0xb5   : > { %638 = vst.msk [vmem:[#allocation5 + $0x20] sm:$0xff] %vm608_vm1, %v2836_v7  ;;  %639 = vst.msk [vmem:[#allocation5 + $0x28] sm:$0xff] %vm608_vm1, %v2836_v7 }
  0xb6   : > { %640 = vst.msk [vmem:[#allocation5 + $0x30] sm:$0xff] %vm608_vm1, %v2836_v7  ;;  %641 = vst.msk [vmem:[#allocation5 + $0x38] sm:$0xff] %vm608_vm1, %v2836_v7 }
 0x172   : > { %v2236_v9 = vpop.f32.mrf.mxu0 }
 0x173   : > { %v585_v10 = vadd.f32 %v2236_v9, %v2142_v8 }
 0x174   : > { %v579_v11 = vpop.f32.mrf.mxu0 }
 0x175   : > { %610 = vst.msk [vmem:[#allocation2 + $0x8] sm:$0xff] %vm608_vm1, %v585_v10  ;;  %v580_v12 = vadd.f32 %v2142_v8, %v579_v11  ;;  %598 = vrot.lane.b32.xlu1 %v585_v10, %s2837_s11  ;;  %592 = vrot.lane.b32.xlu0 %v585_v10, %s2838_s16 }
 0x177   : > { %609 = vst.msk [vmem:[#allocation2] sm:$0xff] %vm608_vm1, %v580_v12 }
 0x179   : > { %596 = vrot.lane.b32.xlu1 %v580_v12, %s2837_s11  ;;  %590 = vrot.lane.b32.xlu0 %v580_v12, %s2838_s16 }
 0x17d   : > { %604 = vrot.lane.b32.xlu1 %v585_v10, %s2839_s30  ;;  %602 = vrot.lane.b32.xlu0 %v580_v12, %s2839_s30 }
 0x1e7   : > { %v599_v13 = vpop.permute.xlu1 %598  ;;  %v593_v14 = vpop.permute.xlu0 %592 }
 0x1e8   : > { %614 = vst.msk [vmem:[#allocation2 + $0x28] sm:$0xff] %vm608_vm1, %v599_v13  ;;  %612 = vst.msk [vmem:[#allocation2 + $0x18] sm:$0xff] %vm608_vm1, %v593_v14 }
 0x1eb   : > { %v597_v15 = vpop.permute.xlu1 %596  ;;  %v591_v16 = vpop.permute.xlu0 %590 }
 0x1ec   : > { %613 = vst.msk [vmem:[#allocation2 + $0x20] sm:$0xff] %vm608_vm1, %v597_v15  ;;  %611 = vst.msk [vmem:[#allocation2 + $0x10] sm:$0xff] %vm608_vm1, %v591_v16 }
 0x1ef   : > { %v605_v17 = vpop.permute.xlu1 %604  ;;  %v603_v18 = vpop.permute.xlu0 %602 }
 0x1f0   : > { %616 = vst.msk [vmem:[#allocation2 + $0x38] sm:$0xff] %vm608_vm1, %v605_v17  ;;  %615 = vst.msk [vmem:[#allocation2 + $0x30] sm:$0xff] %vm608_vm1, %v603_v18 }
 0x1f1 PF: > { %v646_v19 = vld [vmem:[#allocation12 + $0x18] sm:$0xff]  ;;  %v2840_v20 = vmov 0.0   ;;  %v645_v21 = vld [vmem:[#allocation12 + $0x10] sm:$0xff]  ;;  %vm2841_vm3 = vmmov 0   ;;  %v644_v22 = vld [vmem:[#allocation12 + $0x8] sm:$0xff]  ;;  %vm654_vm4 = vcmask 261120  }
 0x1f2   : > { %2237 = vmatprep.subr.mxu0 %v2840_v20  ;;  %2245 = vmatprep.mubr.msk.f32.mxu0 %vm2841_vm3, %v2840_v20  ;;  %v643_v23 = vld [vmem:[#allocation12] sm:$0xff]  ;;  %v642_v24 = vld [vmem:[%s431_s28] sm:$0xff]  ;;  %vm834_vm5 = vcmask 64512   ;;  %v729_v28 = vld [vmem:[#allocation14 + $0x8] sm:$0xff]  ;;  %s3535_s5 = sld [smem:[#allocation35_spill]]  ;;  %s2842_s19 = smov 104  }
 0x1f3   : > { %2238 = vmatpush3.msra.mxu0 %v646_v19  ;;  %2248 = vmatprep.subr.mxu1 %v2840_v20  ;;  %v826_v25 = vld [vmem:[#allocation2] sm:$0xff]  ;;  %v731_v26 = vld [vmem:[#allocation14 + $0x18] sm:$0xff]  ;;  %v728_v29 = vld [vmem:[#allocation14] sm:$0xff]  ;;  %s2843_s2 = smov 120   ;;  %s2844_s7 = smov 112   ;;  %v2845_v52 = vmov 0  }
 0x1f4   : > { %2239 = vmatprep.subr.mxu0 %v2840_v20  ;;  %2256 = vmatprep.mubr.msk.f32.mxu1 %vm2841_vm3, %v2840_v20  ;;  %v730_v27 = vld [vmem:[#allocation14 + $0x10] sm:$0xff]  ;;  %v828_v30 = vld [vmem:[#allocation2 + $0x10] sm:$0xff]  ;;  %v827_v35 = vld [vmem:[#allocation2 + $0x8] sm:$0xff]  ;;  %s3536_s13 = sld [smem:[#allocation37_spill]]  ;;  %vm1343_vm6 = vcmask 7168  }
 0x1f5   : > { %2240 = vmatpush3.msra.mxu0 %v645_v21  ;;  %2249 = vmatpush3.msra.mxu1 %v731_v26  ;;  %v830_v36 = vld [vmem:[#allocation2 + $0x20] sm:$0xff]  ;;  %v829_v42 = vld [vmem:[#allocation2 + $0x18] sm:$0xff]  ;;  %v831_v46 = vld [vmem:[#allocation2 + $0x28] sm:$0xff]  ;;  %s3537_s27 = sld [smem:[#allocation25_spill]] }
 0x1f6   : > { %2241 = vmatprep.subr.mxu0 %v2840_v20  ;;  %2250 = vmatprep.subr.mxu1 %v2840_v20  ;;  %v1168_v1 = vld [vmem:[#allocation3 + $0x8] sm:$0xff]  ;;  %v1167_v3 = vld [vmem:[#allocation3] sm:$0xff]  ;;  %v1170_v11 = vld [vmem:[#allocation3 + $0x18] sm:$0xff] }
 0x1f7   : > { %2242 = vmatpush3.msra.mxu0 %v644_v22  ;;  %2251 = vmatpush3.msra.mxu1 %v730_v27  ;;  %v832_v45 = vld [vmem:[#allocation2 + $0x30] sm:$0xff]  ;;  %v833_v47 = vld [vmem:[#allocation2 + $0x38] sm:$0xff]  ;;  %v1171_v18 = vld [vmem:[#allocation3 + $0x20] sm:$0xff] }
 0x1f8   : > { %2243 = vmatprep.subr.mxu0 %v2840_v20  ;;  %2252 = vmatprep.subr.mxu1 %v2840_v20  ;;  %v2145_v31 = vld [vmem:[%s3535_s5] ss:$0 sm:$0xff]  ;;  %v1169_v13 = vld [vmem:[#allocation3 + $0x10] sm:$0xff] }
 0x1f9   : > { %2244 = vmatpush3.msra.mxu0 %v643_v23  ;;  %2253 = vmatpush3.msra.mxu1 %v729_v28  ;;  %v3288_v17 = vld [vmem:[#allocation3 + $0x30] sm:$0xff]  ;;  %v3294_v23 = vld [vmem:[#allocation3 + $0x38] sm:$0xff] }
 0x1fa   : > { %2246 = vmatmul.mubr.msk.f32.vlgmr.msra.gmra.mxu0 %vm654_vm4, %v642_v24  ;;  %2254 = vmatprep.subr.mxu1 %v2840_v20  ;;  %v2147_v40 = vld [vmem:[%s3536_s13] ss:$0 sm:$0xff] }
 0x1fb   : > { %2261 = vmatprep.mubr.msk.f32.mxu0 %vm834_vm5, %v826_v25  ;;  %2255 = vmatpush3.msra.mxu1 %v728_v29  ;;  %p2169_p9 = scmp.ne.s32.totalorder %s3537_s27, 1 }
 0x1fc   : > { %2257 = vmatmul.mubr.msk.f32.vlgmr.msra.gmra.mxu1 %vm654_vm4, %v642_v24  ;;  %2478 = vset.pattern.permute.xlu1 %v2845_v52  ;;  %v1172_v24 = vld [vmem:[#allocation3 + $0x28] sm:$0xff]  ;;  %s2847_s28 = smov (!%p2169_p9), 8   ;;  %s2848_s29 = smov (!%p2169_p9), 16  }
 0x1fd   : > { %2266 = vmatprep.mubr.msk.f32.mxu1 %vm834_vm5, %v828_v30  ;;  %2477 = vset.pattern.permute.xlu0 %v2845_v52  ;;  %s2849_s24 = smov (!%p2169_p9), 24   ;;  %s3538_s11 = sld [smem:[#allocation39_spill]] (!%p2169_p9) }
 0x2ba   : > { %v724_v32 = vpop.f32.mrf.mxu0 }
 0x2bb   : > { %v725_v33 = vadd.f32 %v2145_v31, %v724_v32 }
 0x2bc   : > { %v2247_v34 = vpop.f32.mrf.mxu0  ;;  %v805_v37 = vpop.f32.mrf.mxu1 }
 0x2bd   : > { %814 = vrot.lane.b32.xlu1 %v725_v33, %s2842_s19  ;;  %810 = vrot.lane.b32.xlu0 %v725_v33, %s2843_s2  ;;  %v3237_v43 = vadd.f32 %v2147_v40, %v805_v37 }
 0x2be   : > { %2259 = vmatprep.subr.msk.mxu0 %vm834_vm5, %v725_v33  ;;  %v2258_v38 = vpop.f32.mrf.mxu1 }
 0x2bf   : > { %2260 = vmatpush3.xpose.msk.msra.mxu0 %vm834_vm5, %v725_v33 }
 0x2c1   : > { %812 = vrot.lane.b32.xlu0 %v725_v33, %s2844_s7 }
 0x2c2   : > { %2262 = vmatmul.mubr.msk.f32.vlgmr.msra.gmra.mxu0 %vm834_vm5, %v827_v35 }
 0x2c3   : > { %2271 = vmatprep.mubr.msk.f32.mxu0 %vm834_vm5, %v830_v36 }
 0x32f   : > { %v811_v39 = vpop.permute.xlu0 %810  ;;  %v815_v41 = vpop.permute.xlu1 %814 }
 0x330   : > { %2264 = vmatprep.subr.msk.mxu1 %vm834_vm5, %v811_v39 }
 0x331   : > { %2265 = vmatpush3.xpose.msk.msra.mxu1 %vm834_vm5, %v811_v39 }
 0x332   : > { %2274 = vmatprep.subr.msk.mxu1 %vm834_vm5, %v815_v41 }
 0x333   : > { %v813_v44 = vpop.permute.xlu0 %812 }
 0x334   : > { %2267 = vmatmul.mubr.msk.f32.vlgmr.msra.gmra.mxu1 %vm834_vm5, %v829_v42  ;;  %2269 = vmatprep.subr.msk.mxu0 %vm834_vm5, %v813_v44 }
 0x335   : > { %2270 = vmatpush3.xpose.msk.msra.mxu0 %vm834_vm5, %v813_v44  ;;  %2275 = vmatpush3.xpose.msk.msra.mxu1 %vm834_vm5, %v815_v41 }
 0x336   : > { %2276 = vmatprep.mubr.msk.f32.mxu1 %vm834_vm5, %v832_v45  ;;  %2279 = vmatprep.subr.mxu0 %v3237_v43 }
 0x338   : > { %2272 = vmatmul.mubr.msk.f32.vlgmr.msra.gmra.mxu0 %vm834_vm5, %v831_v46  ;;  %2277 = vmatmul.mubr.msk.f32.vlgmr.msra.gmra.mxu1 %vm834_vm5, %v833_v47 }
 0x339   : > { %2280 = vmatpush3.msra.mxu0 %v3237_v43 }
 0x382   : > { %v3248_v48 = vpop.f32.mrf.mxu0 }
 0x383   : > { %v1178_v49 = vsel %vm834_vm5, %v3248_v48, -inf }
 0x384   : > { %1179 = vmax.xlane.f32.xlu0 %v1178_v49  ;;  %v3252_v50 = vpop.f32.mrf.mxu0 }
 0x385   : > { %v1175_v51 = vsel %vm834_vm5, %v3252_v50, -inf }
 0x386   : > { %1176 = vmax.xlane.f32.xlu1 %v1175_v51 }
 0x3f4   : > { %v3256_v53 = vpop.f32.mrf.mxu1 }
 0x3f5   : > { %v1184_v54 = vsel %vm834_vm5, %v3256_v53, -inf }
 0x3f6   : > { %v3260_v55 = vpop.f32.mrf.mxu1  ;;  %1185 = vmax.xlane.f32.xlu1 %v1184_v54 }
 0x3f7   : > { %v1181_v56 = vsel %vm834_vm5, %v3260_v55, -inf }
 0x3f8   : > { %v3264_v57 = vpop.f32.mrf.mxu1  ;;  %1182 = vmax.xlane.f32.xlu0 %v1181_v56  ;;  %v3266_v58 = vpop.f32.mrf.mxu0 }
 0x3f9   : > { %v1196_v63 = vsel %vm834_vm5, %v3264_v57, -inf  ;;  %v1190_v0 = vsel %vm834_vm5, %v3266_v58, -inf }
 0x3fa   : > { %v3268_v59 = vpop.f32.mrf.mxu0  ;;  %v3270_v60 = vpop.f32.mrf.mxu1 }
 0x3fb   : > { %v1193_v61 = vsel %vm834_vm5, %v3270_v60, -inf  ;;  %v1187_v62 = vsel %vm834_vm5, %v3268_v59, -inf }
 0x3fc   : > { %1194 = vmax.xlane.f32.xlu1 %v1193_v61  ;;  %1188 = vmax.xlane.f32.xlu0 %v1187_v62 }
 0x400   : > { %1197 = vmax.xlane.f32.xlu1 %v1196_v63  ;;  %1191 = vmax.xlane.f32.xlu0 %v1190_v0 }
 0x40d   : > { %v1180_v2 = vpop.xlane.xlu0 %1179 }
 0x40e   : > { %v1200_v4 = vmax.f32 %v1168_v1, %v1180_v2 }
 0x40f   : > { %v1177_v5 = vpop.xlane.xlu1 %1176 }
 0x410   : > { %v1208_v6 = vsub.f32 %v1168_v1, %v1200_v4  ;;  %1749 = vst.msk [vmem:[#allocation3 + $0x8] sm:$0xff] %vm1343_vm6, %v1200_v4  ;;  %v1199_v7 = vmax.f32 %v1167_v3, %v1177_v5 }
 0x411   : > { %1238 = vperm.xlu1 %2478, %v1200_v4  }
 0x412   : > { %v1217_v8 = vmul.f32 1.442695, %v1208_v6  ;;  %v1207_v9 = vsub.f32 %v1167_v3, %v1199_v7  ;;  %1748 = vst.msk [vmem:[#allocation3] sm:$0xff] %vm1343_vm6, %v1199_v7 }
 0x414   : > { %2479 = vpow2.f32 %v1217_v8  ;;  %v1215_v40 = vmul.f32 1.442695, %v1207_v9 }
 0x416   : > { %1233 = vperm.xlu0 %2477, %v1199_v7  }
 0x41a   : > { %820 = vrot.lane.b32.xlu0 %v3237_v43, %s2844_s7 }
 0x421   : > { %v3284_v10 = vpop.eup %2479 }
 0x422   : > { %1367 = vperm.xlu0 %2477, %v3284_v10  }
 0x47f   : > { %v1186_v12 = vpop.xlane.xlu1 %1185 }
 0x480   : > { %v1202_v14 = vmax.f32 %v1170_v11, %v1186_v12 }
 0x481   : > { %v1183_v15 = vpop.xlane.xlu0 %1182 }
 0x482   : > { %1751 = vst.msk [vmem:[#allocation3 + $0x18] sm:$0xff] %vm1343_vm6, %v1202_v14  ;;  %v1201_v16 = vmax.f32 %v1169_v13, %v1183_v15  ;;  %1248 = vperm.xlu1 %2478, %v1202_v14   ;;  %v1210_v41 = vsub.f32 %v1170_v11, %v1202_v14 }
 0x484   : > { %1750 = vst.msk [vmem:[#allocation3 + $0x10] sm:$0xff] %vm1343_vm6, %v1201_v16  ;;  %v1221_v44 = vmul.f32 1.442695, %v1210_v41  ;;  %v1209_v46 = vsub.f32 %v1169_v13, %v1201_v16  ;;  %v1353_v41 = vld [vmem:[#allocation5 + $0x8] sm:$0xff] }
 0x485   : > { %v1195_v19 = vpop.xlane.xlu1 %1194  ;;  %v1189_v20 = vpop.xlane.xlu0 %1188 }
 0x486   : > { %v3292_v21 = vmax.f32 %v3288_v17, %v1195_v19  ;;  %v1203_v22 = vmax.f32 %v1171_v18, %v1189_v20 }
 0x488   : > { %v1213_v25 = vsub.f32 %v3288_v17, %v3292_v21  ;;  %1754 = vst.msk [vmem:[#allocation3 + $0x30] sm:$0xff] %vm1343_vm6, %v3292_v21  ;;  %v1211_v26 = vsub.f32 %v1171_v18, %v1203_v22  ;;  %1752 = vst.msk [vmem:[#allocation3 + $0x20] sm:$0xff] %vm1343_vm6, %v1203_v22 }
 0x489   : > { %v1198_v27 = vpop.xlane.xlu1 %1197  ;;  %v1192_v28 = vpop.xlane.xlu0 %1191 }
 0x48a   : > { %v1223_v29 = vmul.f32 1.442695, %v1211_v26  ;;  %v3302_v30 = vmax.f32 %v3294_v23, %v1198_v27  ;;  %v1204_v31 = vmax.f32 %v1172_v24, %v1192_v28 }
 0x48c   : > { %v1214_v32 = vsub.f32 %v3294_v23, %v3302_v30  ;;  %1755 = vst.msk [vmem:[#allocation3 + $0x38] sm:$0xff] %vm1343_vm6, %v3302_v30  ;;  %1753 = vst.msk [vmem:[#allocation3 + $0x28] sm:$0xff] %vm1343_vm6, %v1204_v31  ;;  %1258 = vperm.xlu1 %2478, %v1204_v31   ;;  %2481 = vpow2.f32 %v1223_v29  ;;  %v1212_v45 = vsub.f32 %v1172_v24, %v1204_v31  ;;  %v1227_v31 = vmul.f32 1.442695, %v1213_v25 }
 0x48d   : > { %v1239_v33 = vpop.permute.xlu1 %1238 }
 0x48e   : > { %v1272_v34 = vsub.f32 %v3248_v48, %v1239_v33  ;;  %v1225_v47 = vmul.f32 1.442695, %v1212_v45  ;;  %v1219_v48 = vmul.f32 1.442695, %v1209_v46  ;;  %v1229_v26 = vmul.f32 1.442695, %v1214_v32 }
 0x48f   : > { %v1295_v32 = vld [vmem:[#allocation4] sm:$0xff] }
 0x490   : > { %1243 = vperm.xlu1 %2478, %v1201_v16   ;;  %v1281_v37 = vmul.f32 1.442695, %v1272_v34  ;;  %v1352_v46 = vld [vmem:[#allocation5] sm:$0xff] }
 0x491   : > { %v1234_v35 = vpop.permute.xlu0 %1233 }
 0x492   : > { %v1271_v36 = vsub.f32 %v3252_v50, %v1234_v35 }
 0x494   : > { %v1279_v38 = vmul.f32 1.442695, %v1271_v36  ;;  %1253 = vperm.xlu1 %2478, %v1203_v22  }
 0x495   : > { %v821_v39 = vpop.permute.xlu0 %820 }
 0x496   : > { %2483 = vpow2.f32 %v1279_v38  ;;  %2289 = vmatprep.subr.mxu0 %v821_v39 }
 0x497   : > { %2485 = vpow2.f32 %v1281_v37 }
 0x498   : > { %1263 = vperm.xlu1 %2478, %v3292_v21   ;;  %2487 = vpow2.f32 %v1215_v40  ;;  %v1296_v21 = vld [vmem:[#allocation4 + $0x8] sm:$0xff] }
 0x499   : > { %v3312_v42 = vpop.eup %2481  ;;  %2489 = vpow2.f32 %v1221_v44  ;;  %v1304_v25 = vmul.f32 %v3284_v10, %v1296_v21 }
 0x49a   : > { %1382 = vperm.xlu0 %2477, %v3312_v42   ;;  %2491 = vpow2.f32 %v1225_v47 }
 0x49b   : > { %2493 = vpow2.f32 %v1219_v48 }
 0x49c   : > { %1268 = vperm.xlu1 %2478, %v3302_v30  }
 0x49d   : > { %v1368_v23 = vpop.permute.xlu0 %1367 }
 0x49e   : > { %v1401_v47 = vmul.f32 %v1368_v23, %v1353_v41 }
 0x4a0   : > { %817 = vrot.lane.b32.xlu1 %v3237_v43, %s2843_s2 }
 0x4a3   : > { %v2484_v49 = vpop.eup %2483 }
 0x4a4   : > { %v2486_v50 = vpop.eup %2485  ;;  %823 = vrot.lane.b32.xlu1 %v3237_v43, %s2842_s19  ;;  %2281 = vmatprep.mubr.msk.f32.mxu0 %vm834_vm5, %v2484_v49  ;;  %v1311_v43 = vsel %vm834_vm5, %v2484_v49, 0.0 }
 0x4a5   : > { %2282 = vmatmul.mubr.msk.f32.vlgmr.msra.gmra.mxu0 %vm834_vm5, %v2486_v50  ;;  %v3322_v51 = vpop.eup %2487  ;;  %v1314_v61 = vsel %vm834_vm5, %v2486_v50, 0.0 }
 0x4a6   : > { %2290 = vmatpush3.msra.mxu0 %v821_v39  ;;  %v3325_v52 = vpop.eup %2489  ;;  %v1303_v35 = vmul.f32 %v3322_v51, %v1295_v32  ;;  %v1358_v32 = vld [vmem:[#allocation5 + $0x30] sm:$0xff] }
 0x4a7   : > { %v3328_v54 = vpop.eup %2491 }
 0x4a8   : > { %1362 = vperm.xlu1 %2478, %v3322_v51   ;;  %v3331_v56 = vpop.eup %2493 }
 0x4ac   : > { %1377 = vperm.xlu1 %2478, %v3325_v52  }
 0x4b0   : > { %1387 = vperm.xlu1 %2478, %v3328_v54  }
 0x4b4   : > { %1372 = vperm.xlu1 %2478, %v3331_v56  }
 0x4b9   : > { %1312 = vadd.xlane.f32.xlu0 %v1311_v43 }
 0x4d8   : > { %1315 = vadd.xlane.f32.xlu1 %v1314_v61  ;;  %v1298_v61 = vld [vmem:[#allocation4 + $0x18] sm:$0xff] }
 0x4fd   : > { %v1249_v62 = vpop.permute.xlu1 %1248 }
 0x4fe   : > { %v1274_v63 = vsub.f32 %v3256_v53, %v1249_v62  ;;  %v1306_v62 = vmul.f32 %v3325_v52, %v1298_v61 }
 0x500   : > { %v1285_v0 = vmul.f32 1.442695, %v1274_v63 }
 0x502   : > { %2495 = vpow2.f32 %v1285_v0  ;;  %v1300_v0 = vld [vmem:[#allocation4 + $0x28] sm:$0xff] }
 0x507   : > { %v1259_v1 = vpop.permute.xlu1 %1258 }
 0x508   : > { %v1276_v2 = vsub.f32 %v3266_v58, %v1259_v1  ;;  %v1308_v1 = vmul.f32 %v3328_v54, %v1300_v0 }
 0x50a   : > { %v1289_v3 = vmul.f32 1.442695, %v1276_v2 }
 0x50b   : > { %v1244_v4 = vpop.permute.xlu1 %1243 }
 0x50c   : > { %2497 = vpow2.f32 %v1289_v3  ;;  %v1273_v5 = vsub.f32 %v3260_v55, %v1244_v4  ;;  %v1297_v3 = vld [vmem:[#allocation4 + $0x10] sm:$0xff] }
 0x50e   : > { %v1283_v6 = vmul.f32 1.442695, %v1273_v5  ;;  %v1305_v5 = vmul.f32 %v3331_v56, %v1297_v3 }
 0x50f   : > { %v2496_v7 = vpop.eup %2495  ;;  %v1254_v8 = vpop.permute.xlu1 %1253 }
 0x510   : > { %2499 = vpow2.f32 %v1283_v6  ;;  %v1275_v9 = vsub.f32 %v3268_v59, %v1254_v8  ;;  %v1320_v11 = vsel %vm834_vm5, %v2496_v7, 0.0 }
 0x511   : > { %1321 = vadd.xlane.f32.xlu0 %v1320_v11  ;;  %v1301_v11 = vld [vmem:[#allocation4 + $0x30] sm:$0xff] }
 0x512   : > { %v1287_v53 = vmul.f32 1.442695, %v1275_v9 }
 0x513   : > { %v1264_v12 = vpop.permute.xlu1 %1263 }
 0x514   : > { %2501 = vpow2.f32 %v1287_v53  ;;  %v1277_v13 = vsub.f32 %v3270_v60, %v1264_v12 }
 0x515   : > { %v3360_v30 = vpop.permute.xlu0 %1382 }
 0x516   : > { %v1291_v58 = vmul.f32 1.442695, %v1277_v13  ;;  %v1302_v13 = vld [vmem:[#allocation4 + $0x38] sm:$0xff] }
 0x517   : > { %v1269_v14 = vpop.permute.xlu1 %1268 }
 0x518   : > { %2503 = vpow2.f32 %v1291_v58  ;;  %v1278_v15 = vsub.f32 %v3264_v57, %v1269_v14 }
 0x519   : > { %v2498_v55 = vpop.eup %2497 }
 0x51a   : > { %v1293_v16 = vmul.f32 1.442695, %v1278_v15  ;;  %v1326_v18 = vsel %vm834_vm5, %v2498_v55, 0.0 }
 0x51b   : > { %v818_v19 = vpop.permute.xlu1 %817  ;;  %1327 = vadd.xlane.f32.xlu0 %v1326_v18 }
 0x51c   : > { %2505 = vpow2.f32 %v1293_v16  ;;  %2284 = vmatprep.subr.mxu1 %v818_v19  ;;  %v1354_v16 = vld [vmem:[#allocation5 + $0x10] sm:$0xff] }
 0x51d   : > { %v2500_v59 = vpop.eup %2499  ;;  %2285 = vmatpush3.msra.mxu1 %v818_v19  ;;  %2507 = vpow2.f32 %v1229_v26 }
 0x51e   : > { %2286 = vmatprep.mubr.msk.f32.mxu1 %vm834_vm5, %v2500_v59  ;;  %v1317_v20 = vsel %vm834_vm5, %v2500_v59, 0.0  ;;  %2509 = vpow2.f32 %v1227_v31  ;;  %v1359_v31 = vld [vmem:[#allocation5 + $0x38] sm:$0xff] }
 0x51f   : > { %2287 = vmatmul.mubr.msk.f32.vlgmr.msra.gmra.mxu1 %vm834_vm5, %v2496_v7  ;;  %v824_v60 = vpop.permute.xlu1 %823  ;;  %1318 = vadd.xlane.f32.xlu0 %v1317_v20  ;;  %v1299_v7 = vld [vmem:[#allocation4 + $0x20] sm:$0xff] }
 0x520   : > { %2294 = vmatprep.subr.mxu1 %v824_v60  ;;  %v1307_v52 = vmul.f32 %v3312_v42, %v1299_v7  ;;  %v1357_v42 = vld [vmem:[#allocation5 + $0x28] sm:$0xff] }
 0x521   : > { %v2502_v57 = vpop.eup %2501  ;;  %2295 = vmatpush3.msra.mxu1 %v824_v60  ;;  %v1356_v60 = vld [vmem:[#allocation5 + $0x20] sm:$0xff] }
 0x522   : > { %2291 = vmatprep.mubr.msk.f32.mxu0 %vm834_vm5, %v2502_v57  ;;  %v1323_v22 = vsel %vm834_vm5, %v2502_v57, 0.0 }
 0x523   : > { %1324 = vadd.xlane.f32.xlu1 %v1323_v22  ;;  %2292 = vmatmul.mubr.msk.f32.vlgmr.msra.gmra.mxu0 %vm834_vm5, %v2498_v55  ;;  %v1363_v38 = vpop.permute.xlu1 %1362  ;;  %v1355_v55 = vld [vmem:[#allocation5 + $0x18] sm:$0xff] }
 0x524   : > { %v1400_v49 = vmul.f32 %v1363_v38, %v1352_v46 }
 0x525   : > { %v2504_v24 = vpop.eup %2503 }
 0x526   : > { %2296 = vmatprep.mubr.msk.f32.mxu1 %vm834_vm5, %v2504_v24  ;;  %v1329_v27 = vsel %vm834_vm5, %v2504_v24, 0.0 }
 0x527   : > { %1330 = vadd.xlane.f32.xlu1 %v1329_v27  ;;  %v1378_v39 = vpop.permute.xlu1 %1377  ;;  %v1404_v27 = vmul.f32 %v3360_v30, %v1356_v60 }
 0x528   : > { %v1403_v18 = vmul.f32 %v1378_v39, %v1355_v55 }
 0x529   : > { %v2506_v28 = vpop.eup %2505 }
 0x52a   : > { %2297 = vmatmul.mubr.msk.f32.vlgmr.msra.gmra.mxu1 %vm834_vm5, %v2506_v28  ;;  %v1332_v29 = vsel %vm834_vm5, %v2506_v28, 0.0  ;;  %v2508_v33 = vpop.eup %2507 }
 0x52b   : > { %1333 = vadd.xlane.f32.xlu0 %v1332_v29  ;;  %v2510_v34 = vpop.eup %2509  ;;  %v1388_v40 = vpop.permute.xlu1 %1387  ;;  %v1310_v14 = vmul.f32 %v2508_v33, %v1302_v13 }
 0x52c   : > { %v1309_v54 = vmul.f32 %v2510_v34, %v1301_v11  ;;  %v1405_v22 = vmul.f32 %v1388_v40, %v1357_v42 }
 0x52f   : > { %v1373_v17 = vpop.permute.xlu1 %1372 }
 0x530   : > { %v1402_v59 = vmul.f32 %v1373_v17, %v1354_v16 }
 0x538   : > { %1397 = vperm.xlu1 %2478, %v2508_v33  }
 0x541   : > { %1392 = vperm.xlu0 %2477, %v2510_v34  }
 0x542   : > { %v1313_v36 = vpop.xlane.xlu0 %1312 }
 0x543   : > { %v1335_v37 = vadd.f32 %v1313_v36, %v1303_v35 }
 0x545   : > { %1344 = vst.msk [vmem:[#allocation4] sm:$0xff] %vm1343_vm6, %v1335_v37 }
 0x561   : > { %v1316_v44 = vpop.xlane.xlu1 %1315 }
 0x562   : > { %v1336_v45 = vadd.f32 %v1316_v44, %v1304_v25 }
 0x564   : > { %1345 = vst.msk [vmem:[#allocation4 + $0x8] sm:$0xff] %vm1343_vm6, %v1336_v45 }
 0x565   : > { %v2283_v48 = vpop.f32.mrf.mxu0 }
 0x566   : > { %v1733_v50 = vadd.f32 %v2283_v48, %v1401_v47 }
 0x567   : > { %v1480_v51 = vpop.f32.mrf.mxu0 }
 0x568   : > { %1741 = vst.msk [vmem:[#allocation5 + $0x8] sm:$0xff] %vm834_vm5, %v1733_v50  ;;  %v1732_v43 = vadd.f32 %v1480_v51, %v1400_v49 }
 0x56a   : > { %1740 = vst.msk [vmem:[#allocation5] sm:$0xff] %vm834_vm5, %v1732_v43 }
 0x59a   : > { %v1322_v10 = vpop.xlane.xlu0 %1321 }
 0x59b   : > { %v1338_v63 = vadd.f32 %v1322_v10, %v1306_v62 }
 0x59d   : > { %1347 = vst.msk [vmem:[#allocation4 + $0x18] sm:$0xff] %vm1343_vm6, %v1338_v63 }
 0x5a4   : > { %v1328_v2 = vpop.xlane.xlu0 %1327 }
 0x5a5   : > { %v1340_v4 = vadd.f32 %v1328_v2, %v1308_v1 }
 0x5a7   : > { %1349 = vst.msk [vmem:[#allocation4 + $0x28] sm:$0xff] %vm1343_vm6, %v1340_v4 }
 0x5a8   : > { %v1319_v6 = vpop.xlane.xlu0 %1318 }
 0x5a9   : > { %v1337_v8 = vadd.f32 %v1319_v6, %v1305_v5 }
 0x5ab   : > { %1346 = vst.msk [vmem:[#allocation4 + $0x10] sm:$0xff] %vm1343_vm6, %v1337_v8 }
 0x5ac   : > { %v1325_v9 = vpop.xlane.xlu1 %1324 }
 0x5ad   : > { %v1339_v53 = vadd.f32 %v1325_v9, %v1307_v52 }
 0x5af   : > { %1348 = vst.msk [vmem:[#allocation4 + $0x20] sm:$0xff] %vm1343_vm6, %v1339_v53 }
 0x5b0   : > { %v1331_v12 = vpop.xlane.xlu1 %1330 }
 0x5b1   : > { %v1341_v58 = vadd.f32 %v1331_v12, %v1309_v54 }
 0x5b3   : > { %1350 = vst.msk [vmem:[#allocation4 + $0x30] sm:$0xff] %vm1343_vm6, %v1341_v58 }
 0x5b4   : > { %v1334_v56 = vpop.xlane.xlu0 %1333  ;;  %v1398_v33 = vpop.permute.xlu1 %1397 }
 0x5b5   : > { %v1342_v15 = vadd.f32 %v1334_v56, %v1310_v14  ;;  %v1407_v35 = vmul.f32 %v1398_v33, %v1359_v31 }
 0x5b7   : > { %1351 = vst.msk [vmem:[#allocation4 + $0x38] sm:$0xff] %vm1343_vm6, %v1342_v15 }
 0x5bc   : > { %v1393_v34 = vpop.permute.xlu0 %1392 }
 0x5bd   : > { %v1406_v37 = vmul.f32 %v1393_v34, %v1358_v32 }
 0x5df   : > { %v2288_v19 = vpop.f32.mrf.mxu1 }
 0x5e0   : > { %v1735_v20 = vadd.f32 %v2288_v19, %v1403_v18 }
 0x5e1   : > { %v1561_v57 = vpop.f32.mrf.mxu1 }
 0x5e2   : > { %1743 = vst.msk [vmem:[#allocation5 + $0x18] sm:$0xff] %vm834_vm5, %v1735_v20  ;;  %v1734_v24 = vadd.f32 %v1561_v57, %v1402_v59 }
 0x5e3   : > { %v2293_v26 = vpop.f32.mrf.mxu0 }
 0x5e4   : > { %1742 = vst.msk [vmem:[#allocation5 + $0x10] sm:$0xff] %vm834_vm5, %v1734_v24  ;;  %v1737_v28 = vadd.f32 %v2293_v26, %v1405_v22 }
 0x5e5   : > { %v1642_v29 = vpop.f32.mrf.mxu0 }
 0x5e6   : > { %1745 = vst.msk [vmem:[#allocation5 + $0x28] sm:$0xff] %vm834_vm5, %v1737_v28  ;;  %v1736_v23 = vadd.f32 %v1642_v29, %v1404_v27 }
 0x5e8   : > { %1744 = vst.msk [vmem:[#allocation5 + $0x20] sm:$0xff] %vm834_vm5, %v1736_v23 }
 0x5ea   : > { %v2298_v36 = vpop.f32.mrf.mxu1 }
 0x5eb   : > { %v1739_v38 = vadd.f32 %v2298_v36, %v1407_v35  ;;  %1759 = sbr.rel (%p2169_p9) target bundleno = 1988 (0x7c4), region = 92 }
 0x5ec   : > { %v1723_v39 = vpop.f32.mrf.mxu1 }
 0x5ed   : > { %1747 = vst.msk [vmem:[#allocation5 + $0x38] sm:$0xff] %vm834_vm5, %v1739_v38  ;;  %v1738_v30 = vadd.f32 %v1723_v39, %v1406_v37 }
 0x5ef   : > { %1746 = vst.msk [vmem:[#allocation5 + $0x30] sm:$0xff] %vm834_vm5, %v1738_v30 }
 0x5f0   : > { %v1764_v40 = vld [vmem:[#allocation4 + $0x20] sm:$0xff]  ;;  %v1762_v17 = vld [vmem:[#allocation4 + $0x10] sm:$0xff]  ;;  %v1765_v21 = vld [vmem:[#allocation4 + $0x28] sm:$0xff]  ;;  %v2846_v25 = vmov 0   ;;  %vm1858_vm7 = vcmask 130048   ;;  %vm1861_vm8 = vcmask 195584  }
 0x5f1   : > { %2512 = vset.pattern.permute.xlu1 %v2846_v25  ;;  %2511 = vset.pattern.permute.xlu0 %v2846_v25  ;;  %2513 = vrcp.f32 %v1764_v40  ;;  %v1763_v41 = vld [vmem:[#allocation4 + $0x18] sm:$0xff]  ;;  %v1766_v45 = vld [vmem:[#allocation4 + $0x30] sm:$0xff]  ;;  %v1761_v46 = vld [vmem:[#allocation4 + $0x8] sm:$0xff] }
 0x5f2   : > { %2515 = vrcp.f32 %v1762_v17  ;;  %v1767_v44 = vld [vmem:[#allocation4 + $0x38] sm:$0xff]  ;;  %v1760_v47 = vld [vmem:[#allocation4] sm:$0xff]  ;;  %v1867_v63 = vld [vmem:[#allocation15 + $0x18] sm:$0xff] }
 0x5f3   : > { %2517 = vrcp.f32 %v1765_v21  ;;  %v1866_v0 = vld [vmem:[#allocation15 + $0x10] sm:$0xff]  ;;  %2299 = vmatprep.subr.mxu0 %v1867_v63  ;;  %v1778_v1 = vld [vmem:[#allocation5 + $0x10] sm:$0xff]  ;;  %v1865_v2 = vld [vmem:[#allocation15 + $0x8] sm:$0xff] }
 0x5f4   : > { %2519 = vrcp.f32 %v1763_v41  ;;  %2300 = vmatpush3.msra.mxu0 %v1867_v63  ;;  %v1864_v4 = vld [vmem:[#allocation15] sm:$0xff]  ;;  %v1780_v5 = vld [vmem:[#allocation5 + $0x20] sm:$0xff]  ;;  %v1779_v8 = vld [vmem:[#allocation5 + $0x18] sm:$0xff] }
 0x5f5   : > { %2521 = vrcp.f32 %v1767_v44  ;;  %2301 = vmatprep.subr.mxu0 %v1866_v0  ;;  %v1781_v54 = vld [vmem:[#allocation5 + $0x28] sm:$0xff]  ;;  %v1783_v56 = vld [vmem:[#allocation5 + $0x38] sm:$0xff]  ;;  %v1776_v19 = vld [vmem:[#allocation5] sm:$0xff] }
 0x5f6   : > { %2523 = vrcp.f32 %v1766_v45  ;;  %2302 = vmatpush3.msra.mxu0 %v1866_v0  ;;  %v1782_v12 = vld [vmem:[#allocation5 + $0x30] sm:$0xff]  ;;  %v1777_v57 = vld [vmem:[#allocation5 + $0x8] sm:$0xff]  ;;  %v2170_v34 = vld [vmem:[%s3538_s11] ss:$0 sm:$0xff] }
 0x5f7   : > { %2525 = vrcp.f32 %v1761_v46  ;;  %2303 = vmatprep.subr.mxu0 %v1865_v2 }
 0x5f8   : > { %2527 = vrcp.f32 %v1760_v47  ;;  %2304 = vmatpush3.msra.mxu0 %v1865_v2 }
 0x5f9   : > { %2305 = vmatprep.subr.mxu0 %v1864_v4 }
 0x5fa   : > { %2306 = vmatpush3.msra.mxu0 %v1864_v4 }
 0x5fe   : > { %v2514_v48 = vpop.eup %2513 }
 0x5ff   : > { %v2516_v49 = vpop.eup %2515  ;;  %1806 = vperm.xlu1 %2512, %v2514_v48  }
 0x600   : > { %v2518_v50 = vpop.eup %2517  ;;  %1796 = vperm.xlu0 %2511, %v2516_v49  }
 0x601   : > { %v2520_v51 = vpop.eup %2519 }
 0x602   : > { %v2522_v43 = vpop.eup %2521 }
 0x603   : > { %1811 = vperm.xlu1 %2512, %v2518_v50   ;;  %v2524_v61 = vpop.eup %2523 }
 0x604   : > { %1801 = vperm.xlu0 %2511, %v2520_v51   ;;  %v2526_v62 = vpop.eup %2525 }
 0x605   : > { %v2528_v10 = vpop.eup %2527 }
 0x607   : > { %1821 = vperm.xlu1 %2512, %v2522_v43  }
 0x608   : > { %1816 = vperm.xlu0 %2511, %v2524_v61  }
 0x60b   : > { %1791 = vperm.xlu1 %2512, %v2526_v62  }
 0x60c   : > { %1786 = vperm.xlu0 %2511, %v2528_v10  }
 0x67a   : > { %v1807_v3 = vpop.permute.xlu1 %1806 }
 0x67b   : > { %v1797_v6 = vpop.permute.xlu0 %1796  ;;  %v1828_v52 = vmul.f32 %v1807_v3, %v1780_v5 }
 0x67c   : > { %v1826_v7 = vmul.f32 %v1797_v6, %v1778_v1 }
 0x67e   : > { %1834 = vrot.lane.b32.xlu0 %v1826_v7, %s2847_s28  ;;  %v1812_v9 = vpop.permute.xlu1 %1811 }
 0x67f   : > { %v1802_v11 = vpop.permute.xlu0 %1801  ;;  %v1829_v58 = vmul.f32 %v1812_v9, %v1781_v54 }
 0x680   : > { %v1827_v53 = vmul.f32 %v1802_v11, %v1779_v8 }
 0x682   : > { %1836 = vrot.lane.b32.xlu1 %v1827_v53, %s2847_s28  ;;  %1842 = vrot.lane.b32.xlu0 %v1828_v52, %s2848_s29  ;;  %v1822_v15 = vpop.permute.xlu1 %1821 }
 0x683   : > { %v1817_v13 = vpop.permute.xlu0 %1816  ;;  %v1831_v55 = vmul.f32 %v1822_v15, %v1783_v56 }
 0x684   : > { %v1830_v14 = vmul.f32 %v1817_v13, %v1782_v12 }
 0x686   : > { %1844 = vrot.lane.b32.xlu1 %v1829_v58, %s2848_s29  ;;  %1850 = vrot.lane.b32.xlu0 %v1830_v14, %s2849_s24  ;;  %v1792_v18 = vpop.permute.xlu1 %1791 }
 0x687   : > { %v1787_v16 = vpop.permute.xlu0 %1786  ;;  %v1825_v28 = vmul.f32 %v1792_v18, %v1777_v57 }
 0x688   : > { %v1824_v60 = vmul.f32 %v1787_v16, %v1776_v19 }
 0x68a   : > { %1852 = vrot.lane.b32.xlu1 %v1831_v55, %s2849_s24 }
 0x6f0   : > { %v1835_v42 = vpop.permute.xlu0 %1834 }
 0x6f1   : > { %v1856_v22 = vsel %vm834_vm5, %v1824_v60, %v1835_v42 }
 0x6f4   : > { %v1837_v59 = vpop.permute.xlu1 %1836  ;;  %v1843_v20 = vpop.permute.xlu0 %1842 }
 0x6f5   : > { %v1859_v24 = vsel %vm1858_vm7, %v1856_v22, %v1843_v20  ;;  %v1857_v31 = vsel %vm834_vm5, %v1825_v28, %v1837_v59 }
 0x6f8   : > { %v1845_v26 = vpop.permute.xlu1 %1844  ;;  %v1851_v27 = vpop.permute.xlu0 %1850 }
 0x6f9   : > { %v1862_v29 = vsel %vm1861_vm8, %v1859_v24, %v1851_v27  ;;  %v1860_v33 = vsel %vm1858_vm7, %v1857_v31, %v1845_v26 }
 0x6fa   : > { %2307 = vmatprep.mubr.msk.f32.mxu0 %vm654_vm4, %v1862_v29 }
 0x6fc   : > { %v1853_v23 = vpop.permute.xlu1 %1852 }
 0x6fd   : > { %v1863_v32 = vsel %vm1861_vm8, %v1860_v33, %v1853_v23 }
 0x6fe   : > { %2308 = vmatmul.mubr.msk.f32.vlgmr.msra.gmra.mxu0 %vm654_vm4, %v1863_v32 }
 0x7be   : > { %v2309_v35 = vpop.f32.mrf.mxu0 }
 0x7bf   : > { %v1953_v36 = vadd.f32 %v2309_v35, %v2170_v34 }
 0x7c0   : > { %v1947_v37 = vpop.f32.mrf.mxu0 }
 0x7c1   : > { %1957 = vst.msk [vmem:[%s3175_s26 + $0x8] sm:$0xff] %vm654_vm4, %v1953_v36  ;;  %v1948_v38 = vadd.f32 %v2170_v34, %v1947_v37 }
 0x7c3   : > { %1956 = vst.msk [vmem:[%s3175_s26] sm:$0xff] %vm654_vm4, %v1948_v38 }
 0x7c4 PF: > { %s3539_s16 = sld [smem:[#allocation26_spill]]  ;;  %s1972_s25 = sshll.u32 %s3175_s26, 4  ;;  %s3404_s25 = int_to_ptr.vmem [resolvable:$true] %s1972_s25 }
 0x7c5   : > { %s3540_s30 = sld [smem:[#allocation27_spill]]  ;;  %s1959_s6 = scalar_lea.sflag [#allocation8], %s3144_s3 }
 0x7c6   : > { %s3541_s19 = sld [smem:[#allocation40_spill]]  ;;  %s2689_s13 = scalar_lea.vmem %s3404_s25, 256 }
 0x7c7   : > { %p2690_p5 = scmp.ne.s32.totalorder %s3404_s25, %s2689_s13  ;;  %s2850_s27 = smov [#allocation17]  }
 0x7c8   : > { %s2693_s28 = sshll.u32 %s2850_s27, 4  ;;  %s2694_s28 = int_to_ptr.vmem [resolvable:$false] %s2693_s28 }
 0x7c9   : > { %s2695_s29 = scalar_lea.vmem %s2694_s28, 512  ;;  %p2696_p13 = scmp.lt.s32.totalorder %s3404_s25, %s2694_s28 }
 0x7ca   : > { %s2179_s8 = sshll.u32 %s3539_s16, 8  ;;  %p2697_p1 = scmp.lt.s32.totalorder %s2695_s29, %s2689_s13 }
 0x7cb   : > { %p3543_p8 = scmp.ne.s32.totalorder %s3540_s30, 0 }
 0x7cc   : > { %s3542_s2 = smov %s3541_s19  ;;  %s3401_s7 = scalar_lea.hbm %s3541_s19, %s2179_s8 }
 0x7cd   : > { %p2691_p2 = pnand %p2690_p5, %p3543_p8  ;;  %p2698_p4 = por %p2697_p1, %p2696_p13 }
 0x7cf   : > { %p2692_p10 = pneg %p2691_p2 }
 0x7d1   : > { %p2699_p11 = pnand %p2698_p4, %p2692_p10 }
 0x7d3   : > { %2702 = shalt.err (!%p2699_p11)
}
 0x7d4   : > { %s2703_s26 = scalar_lea.hbm %s3401_s7, 256  ;;  %s2707_s10 = scalar_lea.hbm %s3542_s2, 512 }
 0x7d5   : > { %p2704_p0 = scmp.ne.s32.totalorder %s3401_s7, %s2703_s26  ;;  %p2708_p7 = scmp.lt.s32.totalorder %s3401_s7, %s3542_s2 }
 0x7d6   : > { %p2709_p12 = scmp.lt.s32.totalorder %s2707_s10, %s2703_s26 }
 0x7d7   : > { %p2705_p6 = pnand %p2704_p0, %p3543_p8 }
 0x7d8   : > { %p2710_p9 = por %p2709_p12, %p2708_p7 }
 0x7d9   : > { %p2706_p3 = pneg %p2705_p6 }
 0x7db   : > { %p2711_p5 = pnand %p2710_p9, %p2706_p3 }
 0x7dd   : > { %2714 = shalt.err (!%p2711_p5)
}
 0x7de   : > { %s2851_s8 = smov 128   ;;  %s2852_s20 = smov 8  }
 0x7df   : > { %2330 = dma.vmem_to_hbm [thread:$0]  (%p3543_p8), %s3404_s25, 256, %s3401_s7, %s1959_s6, %s2851_s8, %s2851_s8, %s2852_s20  }
 0x7e0 PF: > { %s3544_s5 = sld [smem:[#allocation24_spill]]  ;;  %p2365_p2 = scmp.ge.s32.totalorder %s2825_s23, 2 }
 0x7e1   : > { %s3545_s19 = sld [smem:[#allocation28_spill]] }
 0x7e6   : > { %s1987_s13 = sand.u32 1, %s3544_s5  }
 0x7e7   : > { %p3546_p10 = scmp.ne.s32.totalorder %s3545_s19, 0  ;;  %s1988_s27 = scalar_lea.sflag [#allocation8], %s1987_s13 }
 0x7e9   : > { %p2353_p13 = pnand %p2365_p2, %p3546_p10 }
 0x7eb   : > { %p2354_p1 = pneg %p2353_p13 }
 0x7ed   : > { %2780 = dma.done.wait (%p2354_p1), %s1988_s27, 256  }
 0x7ee   : > { %2782 = vsyncadd (%p2354_p1), %s1988_s27, 4294967040  ;;  %s31_s23 = sadd.s32 1, %s2825_s23   ;;  %s3547_s3 = sld [smem:[#allocation29_spill]] }
 0x7ef   : > { %p28_p4 = scmp.ge.s32.totalorder %s31_s23, 6   ;;  %s3548_s13 = smov %s2789_s14 }
 0x7f0   : > { %s3549_s14 = smov %s2793_s15  ;;  %s3550_s15 = smov %s3123_s0 }
 0x7f1   : > { %s3551_s16 = smov %s2801_s17  ;;  %s3552_s17 = smov %s2805_s18 }
 0x7f2   : > { %s3553_s18 = smov %s3120_s12  ;;  %s3554_s19 = smov %s2817_s21 }
 0x7f3   : > { %s3555_s20 = smov %s2821_s22  ;;  %s3557_s22 = smov %s3563_s4 }
 0x7f4   : > { %s3556_s21 = smov %s3547_s3  ;;  %30 = sbr.rel (!%p28_p4) target bundleno = 24 (0x18), region = 142 }
 0x7f9   :  { %1993 = vsyncpa [#allocation7], 1 }
 0x7fa   :  { %1995 = vsyncpa [#allocation7 + $0x1], 1 }
 0x7fb   :  { %1996 = vsyncpa [#allocation10], 1 }
 0x7fc   :  { %1998 = vsyncpa [#allocation10 + $0x1], 1 }
 0x7fd   :  { %1999 = vsyncpa [#allocation13], 1 }
 0x7fe   :  { %2000 = vsyncpa [#allocation16], 1 }
 0x7ff   :  { %2001 = vsyncpa [#allocation8], 1 }
 0x800   :  { %2003 = vsyncpa [#allocation8 + $0x1], 1 }

</bundles_post_ra>
